<compile_context>
chip_gen: v7x
topology: tpu7x:2x2x1
jax: 0.10.0
libtpu: 0.0.40
codegen_flags: <defaults>
</compile_context>

<pallas_src>
import jax
import jax.numpy as jnp
import numpy as np
from jax.experimental import pallas as pl
from jax.experimental.pallas import tpu as pltpu


def gat_kernel(topic_ref, gce_ref, mask_ref, wc_ref, at_ref, ag_ref,
               u_ref, tvec_ref):
    bb = tvec_ref.shape[0]            # topic block: (Bb, 1, Dout)
    rows, dout = u_ref.shape          # u block:     (Bb*N, Dout)
    n = rows // bb

    te = topic_ref[...]               # (Bb*N, Din), compute dtype
    ge = gce_ref[...]                 # (Bb*N, Din)

    # Only surviving projections after the attention fold: one Dout-wide matmul (fc)
    # plus two 2-column score matmuls.  f32 MXU accumulation.
    ctx = jnp.dot(ge, wc_ref[...], preferred_element_type=jnp.float32)          # (rows, Dout)
    scores = (jnp.dot(te, at_ref[...], preferred_element_type=jnp.float32)
              + jnp.dot(ge, ag_ref[...], preferred_element_type=jnp.float32))   # (rows, 2)

    # Additive mask (-1e9 on masked nodes), then leaky_relu — same op order as torch.
    madd = mask_ref[0]                                         # (Bb, N) f32
    s = scores.reshape(bb, n, 2) + madd[:, :, None]            # (Bb, N, 2)
    s = jnp.where(s >= 0.0, s, 0.01 * s)                       # leaky_relu(0.01)

    # Softmax over the node axis, per batch item, per head (f32 statistics).
    m = jnp.max(s, axis=1, keepdims=True)
    e = jnp.exp(s - m)
    attn = e / jnp.sum(e, axis=1, keepdims=True)               # (Bb, N, 2)
    attn2d = attn.reshape(rows, 2)                             # row order matches ctx

    u_ref[...] = jnp.tanh(attn2d[:, 0:1] * ctx).astype(u_ref.dtype)

    weighted = attn2d[:, 1:2] * ctx                            # (rows, Dout)
    tvec_ref[...] = jnp.tanh(
        jnp.sum(weighted.reshape(bb, n, dout), axis=1, keepdims=True)
    ).astype(tvec_ref.dtype)


def _pick_batch_block(B, N, Din, Dout, in_bytes, out_bytes, budget_bytes):
    """Largest Bb dividing B such that the per-step working set fits the VMEM budget
    and (when possible) the grid keeps >= 2 steps so both v7x TensorCores get work."""
    min_grid = 2 if B >= 2 else 1
    # two inputs (double-buffered) + u output (double-buffered) + rough f32 intermediates
    per_item = N * (2 * Din * in_bytes * 2 + Dout * out_bytes * 2 + Dout * 4 * 4)
    best = 1
    for bb in range(1, B + 1):
        if B % bb != 0 or (B // bb) < min_grid:
            continue
        if bb * per_item <= budget_bytes:
            best = max(best, bb)
    return best


def gat_layer(topic_embed, global_context_embed, mask, params, *,
              batch_block=None, compute_dtype=jnp.float32, out_dtype=jnp.float32,
              vmem_limit_bytes=None, vmem_budget_bytes=20 << 20,
              single_buffer_weights=True):
    """Pallas GATLayer forward.

    params (weights stored transposed vs. torch, i.e. (in_features, out_features)):
      w_t (Din, Dout), w_g (Din, Dout), w_c (Din, Dout), attn1 (2*Dout,), attn2 (2*Dout,)
    mask: bool (B, N), True == masked.
    Returns (u (B, N, Dout), topic (B, Dout)) in out_dtype.
    """
    B, N, Din = topic_embed.shape
    Dout = params["w_c"].shape[1]

    in_bytes = np.dtype(compute_dtype).itemsize
    out_bytes = np.dtype(out_dtype).itemsize
    if batch_block is None:
        batch_block = _pick_batch_block(B, N, Din, Dout, in_bytes, out_bytes,
                                        vmem_budget_bytes)
    Bb = batch_block
    assert B % Bb == 0, "batch_block must divide batch"
    grid = (B // Bb,)
    rows = Bb * N

    # ---- one-time wrapper-side operand prep (XLA level, outside the kernel) ----
    # Fold the attention vectors into the ft/fg weights (in f32):
    #   cat([te @ w_t, ge @ w_g]) @ A  ==  te @ (w_t @ A[:Dout]) + ge @ (w_g @ A[Dout:])
    attn_mat = jnp.stack([params["attn1"], params["attn2"]], axis=1).astype(jnp.float32)  # (2*Dout, 2)
    a_t = (params["w_t"].astype(jnp.float32) @ attn_mat[:Dout, :]).astype(compute_dtype)  # (Din, 2)
    a_g = (params["w_g"].astype(jnp.float32) @ attn_mat[Dout:, :]).astype(compute_dtype)  # (Din, 2)
    w_c = params["w_c"].astype(compute_dtype)                                             # (Din, Dout)

    topic2d = topic_embed.reshape(B * N, Din).astype(compute_dtype)
    gce2d = global_context_embed.reshape(B * N, Din).astype(compute_dtype)
    # Lane-dense additive mask: (grid, Bb, N); the block's last two dims equal the array's.
    mask_add = (mask.astype(jnp.float32) * -1000000000.0).reshape(B // Bb, Bb, N)

    args = (topic2d, gce2d, mask_add, w_c, a_t, a_g)

    def build(single_buffer):
        def wspec(shape):
            idx = lambda b: (0,) * len(shape)
            if single_buffer:
                return pl.BlockSpec(shape, idx, pipeline_mode=pl.Buffered(1))
            return pl.BlockSpec(shape, idx)

        grid_spec = pltpu.PrefetchScalarGridSpec(
            num_scalar_prefetch=0,
            grid=grid,
            in_specs=[
                pl.BlockSpec((rows, Din), lambda b: (b, 0)),       # topic rows
                pl.BlockSpec((rows, Din), lambda b: (b, 0)),       # global-context rows
                pl.BlockSpec((1, Bb, N), lambda b: (b, 0, 0)),     # additive mask
                wspec((Din, Dout)),                                # w_c
                wspec((Din, 2)),                                   # folded ft . attn
                wspec((Din, 2)),                                   # folded fg . attn
            ],
            out_specs=(
                pl.BlockSpec((rows, Dout), lambda b: (b, 0)),      # u rows (lane-dense)
                pl.BlockSpec((Bb, 1, Dout), lambda b: (b, 0, 0)),  # topic (lane-dense)
            ),
        )
        return pl.pallas_call(
            gat_kernel,
            out_shape=(jax.ShapeDtypeStruct((B * N, Dout), out_dtype),
                       jax.ShapeDtypeStruct((B, 1, Dout), out_dtype)),
            grid_spec=grid_spec,
            compiler_params=pltpu.CompilerParams(
                dimension_semantics=("parallel",),
                vmem_limit_bytes=vmem_limit_bytes),
        )

    try:
        u2d, topic3 = build(single_buffer_weights)(*args)
    except Exception:
        if not single_buffer_weights:
            raise
        # pipeline_mode=pl.Buffered(1) unsupported in this jax build; fall back to the
        # default double-buffered weight blocks (weights are tiny at these sizes).
        u2d, topic3 = build(False)(*args)

    return u2d.reshape(B, N, Dout), topic3[:, 0, :]


def reference(topic_embed, gce, mask, params):
    """Pure-JAX replica of the PyTorch GATLayer forward (f32)."""
    src = topic_embed @ params["w_t"]
    dst = gce @ params["w_g"]
    cat = jnp.concatenate([src, dst], axis=-1)

    def head(attn_vec):
        z = cat @ attn_vec                                   # (B, N)
        z = jnp.where(mask, -1000000000.0, z)                # masked_fill BEFORE leaky_relu
        z = jnp.where(z >= 0, z, 0.01 * z)                   # leaky_relu
        return jax.nn.softmax(z, axis=-1)

    c = gce @ params["w_c"]
    a1 = head(params["attn1"])
    a2 = head(params["attn2"])
    u = jnp.tanh(a1[..., None] * c)
    topic = jnp.tanh(jnp.sum(a2[..., None] * c, axis=1))
    return u, topic


if __name__ == "__main__":
    # Small but lane-dense shapes (last dims kept at 128).
    B, N, Din, Dout = 4, 8, 128, 128

    key = jax.random.PRNGKey(0)
    ks = jax.random.split(key, 7)
    scale = 0.1
    params = {
        "w_t": jax.random.normal(ks[0], (Din, Dout), jnp.float32) * scale,
        "w_g": jax.random.normal(ks[1], (Din, Dout), jnp.float32) * scale,
        "w_c": jax.random.normal(ks[2], (Din, Dout), jnp.float32) * scale,
        "attn1": jax.random.normal(ks[3], (2 * Dout,), jnp.float32) * scale,
        "attn2": jax.random.normal(ks[4], (2 * Dout,), jnp.float32) * scale,
    }
    topic_embed = jax.random.normal(ks[5], (B, N, Din), jnp.float32)
    global_ctx = jax.random.normal(ks[6], (B, N, Din), jnp.float32)
    # True == masked (torch masked_fill semantics); keep >=1 unmasked node per row.
    mask = jnp.zeros((B, N), jnp.bool_).at[:, -2:].set(True)

    u_ref, t_ref = reference(topic_embed, global_ctx, mask, params)

    # f32 path (matches the PyTorch module numerically).
    u, topic = gat_layer(topic_embed, global_ctx, mask, params)
    u, topic = jax.block_until_ready((u, topic))
    assert u.shape == (B, N, Dout) and topic.shape == (B, Dout)
    assert np.allclose(np.asarray(u), np.asarray(u_ref), rtol=1e-3, atol=1e-3), "u mismatch (f32)"
    assert np.allclose(np.asarray(topic), np.asarray(t_ref), rtol=1e-3, atol=1e-3), "topic mismatch (f32)"

    # bf16 compute + bf16 outputs path (v6e/v7x; keep f32 on v5e — no bf16 VPU/EUP there).
    u16, t16 = gat_layer(topic_embed, global_ctx, mask, params,
                         compute_dtype=jnp.bfloat16, out_dtype=jnp.bfloat16)
    u16, t16 = jax.block_until_ready((u16, t16))
    u16_f = np.asarray(u16.astype(jnp.float32))
    t16_f = np.asarray(t16.astype(jnp.float32))
    assert np.allclose(u16_f, np.asarray(u_ref), rtol=3e-2, atol=3e-2), "u mismatch (bf16)"
    assert np.allclose(t16_f, np.asarray(t_ref), rtol=3e-2, atol=3e-2), "topic mismatch (bf16)"

    print("KERNEL_OK")
</pallas_src>

<mosaic_0001>
module attributes {stable_mosaic.version = 11 : i64} {
  func.func @gat_kernel(%arg0: i32, %arg1: memref<16x128xf32, #tpu.memory_space<vmem>>, %arg2: memref<16x128xf32, #tpu.memory_space<vmem>>, %arg3: memref<1x2x8xf32, #tpu.memory_space<vmem>>, %arg4: memref<128x128xf32, #tpu.memory_space<vmem>>, %arg5: memref<128x2xf32, #tpu.memory_space<vmem>>, %arg6: memref<128x2xf32, #tpu.memory_space<vmem>>, %arg7: memref<16x128xf32, #tpu.memory_space<vmem>>, %arg8: memref<2x1x128xf32, #tpu.memory_space<vmem>>) attributes {dimension_semantics = [#tpu.dimension_semantics<parallel>], iteration_bounds = array<i64: 2>, scalar_prefetch = 0 : i64, scratch_operands = 0 : i64, tpu.core_type = #tpu.core_type<tc>, window_params = [{transform_indices = @transform_0, window_bounds = array<i64: 16, 128>}, {transform_indices = @transform_1, window_bounds = array<i64: 16, 128>}, {transform_indices = @transform_2, window_bounds = array<i64: 1, 2, 8>}, {pipeline_mode = #tpu.pipeline_mode<synchronous>, transform_indices = @transform_3, window_bounds = array<i64: 128, 128>}, {pipeline_mode = #tpu.pipeline_mode<synchronous>, transform_indices = @transform_4, window_bounds = array<i64: 128, 2>}, {pipeline_mode = #tpu.pipeline_mode<synchronous>, transform_indices = @transform_5, window_bounds = array<i64: 128, 2>}, {transform_indices = @transform_6, window_bounds = array<i64: 16, 128>}, {transform_indices = @transform_7, window_bounds = array<i64: 2, 1, 128>}]} {
    %c0 = arith.constant 0 : index
    %c0_0 = arith.constant 0 : index
    %0 = vector.load %arg1[%c0, %c0_0] : memref<16x128xf32, #tpu.memory_space<vmem>>, vector<16x128xf32>
    %c0_1 = arith.constant 0 : index
    %c0_2 = arith.constant 0 : index
    %1 = vector.load %arg2[%c0_1, %c0_2] : memref<16x128xf32, #tpu.memory_space<vmem>>, vector<16x128xf32>
    %c0_3 = arith.constant 0 : index
    %c0_4 = arith.constant 0 : index
    %2 = vector.load %arg4[%c0_3, %c0_4] : memref<128x128xf32, #tpu.memory_space<vmem>>, vector<128x128xf32>
    %cst = arith.constant dense<0.000000e+00> : vector<16x128xf32>
    %3 = tpu.matmul %1, %2, %cst {dimension_numbers = #tpu.dot_dimension_numbers<[1], [0], [0], [1], [0, 0, 1, 1], [], []>} : vector<16x128xf32>, vector<128x128xf32>, vector<16x128xf32> -> vector<16x128xf32>
    %c0_5 = arith.constant 0 : index
    %c0_6 = arith.constant 0 : index
    %4 = vector.load %arg5[%c0_5, %c0_6] : memref<128x2xf32, #tpu.memory_space<vmem>>, vector<128x2xf32>
    %cst_7 = arith.constant dense<0.000000e+00> : vector<16x2xf32>
    %5 = tpu.matmul %0, %4, %cst_7 {dimension_numbers = #tpu.dot_dimension_numbers<[1], [0], [0], [1], [0, 0, 1, 1], [], []>} : vector<16x128xf32>, vector<128x2xf32>, vector<16x2xf32> -> vector<16x2xf32>
    %c0_8 = arith.constant 0 : index
    %c0_9 = arith.constant 0 : index
    %6 = vector.load %arg6[%c0_8, %c0_9] : memref<128x2xf32, #tpu.memory_space<vmem>>, vector<128x2xf32>
    %cst_10 = arith.constant dense<0.000000e+00> : vector<16x2xf32>
    %7 = tpu.matmul %1, %6, %cst_10 {dimension_numbers = #tpu.dot_dimension_numbers<[1], [0], [0], [1], [0, 0, 1, 1], [], []>} : vector<16x128xf32>, vector<128x2xf32>, vector<16x2xf32> -> vector<16x2xf32>
    %8 = arith.addf %5, %7 : vector<16x2xf32>
    %c0_11 = arith.constant 0 : index
    %c0_12 = arith.constant 0 : index
    %c0_13 = arith.constant 0 : index
    %9 = vector.load %arg3[%c0_11, %c0_12, %c0_13] : memref<1x2x8xf32, #tpu.memory_space<vmem>>, vector<1x2x8xf32>
    %10 = vector.shape_cast %9 : vector<1x2x8xf32> to vector<2x8xf32>
    %11 = vector.shape_cast %8 : vector<16x2xf32> to vector<2x8x2xf32>
    %12 = vector.shape_cast %10 : vector<2x8xf32> to vector<2x8x1xf32>
    %13 = vector.broadcast %12 : vector<2x8x1xf32> to vector<2x8x2xf32>
    %14 = arith.addf %11, %13 : vector<2x8x2xf32>
    %cst_14 = arith.constant 0.000000e+00 : f32
    %15 = vector.broadcast %cst_14 : f32 to vector<2x8x2xf32>
    %16 = arith.cmpf oge, %14, %15 : vector<2x8x2xf32>
    %cst_15 = arith.constant 0.00999999977 : f32
    %17 = vector.broadcast %cst_15 : f32 to vector<2x8x2xf32>
    %18 = arith.mulf %17, %14 : vector<2x8x2xf32>
    %19 = arith.select %16, %14, %18 : vector<2x8x2xi1>, vector<2x8x2xf32>
    %cst_16 = arith.constant dense<0xFF800000> : vector<2x2xf32>
    %20 = vector.multi_reduction <maximumf>, %19, %cst_16 [1] : vector<2x8x2xf32> to vector<2x2xf32>
    %21 = vector.shape_cast %20 : vector<2x2xf32> to vector<2x1x2xf32>
    %22 = vector.broadcast %21 : vector<2x1x2xf32> to vector<2x8x2xf32>
    %23 = arith.subf %19, %22 : vector<2x8x2xf32>
    %24 = math.exp %23 : vector<2x8x2xf32>
    %cst_17 = arith.constant dense<0.000000e+00> : vector<2x2xf32>
    %25 = vector.multi_reduction <add>, %24, %cst_17 [1] : vector<2x8x2xf32> to vector<2x2xf32>
    %26 = vector.shape_cast %25 : vector<2x2xf32> to vector<2x1x2xf32>
    %27 = vector.broadcast %26 : vector<2x1x2xf32> to vector<2x8x2xf32>
    %28 = arith.divf %24, %27 : vector<2x8x2xf32>
    %29 = vector.shape_cast %28 : vector<2x8x2xf32> to vector<16x2xf32>
    %30 = vector.extract_strided_slice %29 {offsets = [0, 0], sizes = [16, 1], strides = [1, 1]} : vector<16x2xf32> to vector<16x1xf32>
    %31 = vector.broadcast %30 : vector<16x1xf32> to vector<16x128xf32>
    %32 = arith.mulf %31, %3 : vector<16x128xf32>
    %33 = math.tanh %32 : vector<16x128xf32>
    %c0_18 = arith.constant 0 : index
    %c0_19 = arith.constant 0 : index
    %34 = vector.load %arg7[%c0_18, %c0_19] : memref<16x128xf32, #tpu.memory_space<vmem>>, vector<16x128xf32>
    tpu.vector_store %arg7[%c0_18, %c0_19], %33 {strides = array<i32>} : memref<16x128xf32, #tpu.memory_space<vmem>>, vector<16x128xf32>,
    %35 = vector.extract_strided_slice %29 {offsets = [0, 1], sizes = [16, 1], strides = [1, 1]} : vector<16x2xf32> to vector<16x1xf32>
    %36 = vector.broadcast %35 : vector<16x1xf32> to vector<16x128xf32>
    %37 = arith.mulf %36, %3 : vector<16x128xf32>
    %38 = vector.shape_cast %37 : vector<16x128xf32> to vector<2x8x128xf32>
    %cst_20 = arith.constant dense<0.000000e+00> : vector<2x128xf32>
    %39 = vector.multi_reduction <add>, %38, %cst_20 [1] : vector<2x8x128xf32> to vector<2x128xf32>
    %40 = vector.shape_cast %39 : vector<2x128xf32> to vector<2x1x128xf32>
    %41 = math.tanh %40 : vector<2x1x128xf32>
    %c0_21 = arith.constant 0 : index
    %c0_22 = arith.constant 0 : index
    %c0_23 = arith.constant 0 : index
    %42 = vector.load %arg8[%c0_21, %c0_22, %c0_23] : memref<2x1x128xf32, #tpu.memory_space<vmem>>, vector<2x1x128xf32>
    tpu.vector_store %arg8[%c0_21, %c0_22, %c0_23], %41 {strides = array<i32>} : memref<2x1x128xf32, #tpu.memory_space<vmem>>, vector<2x1x128xf32>,
    return
  }
  func.func @transform_0(%arg0: i32) -> (i32, i32) {
    %c0_i32 = arith.constant 0 : i32
    %c0_i32_0 = arith.constant 0 : i32
    return %arg0, %c0_i32 : i32, i32
  }
  func.func @transform_1(%arg0: i32) -> (i32, i32) {
    %c0_i32 = arith.constant 0 : i32
    %c0_i32_0 = arith.constant 0 : i32
    return %arg0, %c0_i32 : i32, i32
  }
  func.func @transform_2(%arg0: i32) -> (i32, i32, i32) {
    %c0_i32 = arith.constant 0 : i32
    %c0_i32_0 = arith.constant 0 : i32
    %c0_i32_1 = arith.constant 0 : i32
    return %arg0, %c0_i32, %c0_i32_0 : i32, i32, i32
  }
  func.func @transform_3(%arg0: i32) -> (i32, i32) {
    %c0_i32 = arith.constant 0 : i32
    %c0_i32_0 = arith.constant 0 : i32
    %c0_i32_1 = arith.constant 0 : i32
    return %c0_i32, %c0_i32_0 : i32, i32
  }
  func.func @transform_4(%arg0: i32) -> (i32, i32) {
    %c0_i32 = arith.constant 0 : i32
    %c0_i32_0 = arith.constant 0 : i32
    %c0_i32_1 = arith.constant 0 : i32
    return %c0_i32, %c0_i32_0 : i32, i32
  }
  func.func @transform_5(%arg0: i32) -> (i32, i32) {
    %c0_i32 = arith.constant 0 : i32
    %c0_i32_0 = arith.constant 0 : i32
    %c0_i32_1 = arith.constant 0 : i32
    return %c0_i32, %c0_i32_0 : i32, i32
  }
  func.func @transform_6(%arg0: i32) -> (i32, i32) {
    %c0_i32 = arith.constant 0 : i32
    %c0_i32_0 = arith.constant 0 : i32
    return %arg0, %c0_i32 : i32, i32
  }
  func.func @transform_7(%arg0: i32) -> (i32, i32, i32) {
    %c0_i32 = arith.constant 0 : i32
    %c0_i32_0 = arith.constant 0 : i32
    %c0_i32_1 = arith.constant 0 : i32
    return %arg0, %c0_i32, %c0_i32_0 : i32, i32, i32
  }
}

module attributes {stable_mosaic.version = 11 : i64} {
  func.func @gat_kernel(%arg0: i32, %arg1: memref<16x128xf32, #tpu.memory_space<vmem>>, %arg2: memref<16x128xf32, #tpu.memory_space<vmem>>, %arg3: memref<1x2x8xf32, #tpu.memory_space<vmem>>, %arg4: memref<128x128xf32, #tpu.memory_space<vmem>>, %arg5: memref<128x2xf32, #tpu.memory_space<vmem>>, %arg6: memref<128x2xf32, #tpu.memory_space<vmem>>, %arg7: memref<16x128xf32, #tpu.memory_space<vmem>>, %arg8: memref<2x1x128xf32, #tpu.memory_space<vmem>>) attributes {dimension_semantics = [#tpu.dimension_semantics<parallel>], iteration_bounds = array<i64: 2>, scalar_prefetch = 0 : i64, scratch_operands = 0 : i64, tpu.core_type = #tpu.core_type<tc>, window_params = [{transform_indices = @transform_0, window_bounds = array<i64: 16, 128>}, {transform_indices = @transform_1, window_bounds = array<i64: 16, 128>}, {transform_indices = @transform_2, window_bounds = array<i64: 1, 2, 8>}, {pipeline_mode = #tpu.pipeline_mode<synchronous>, transform_indices = @transform_3, window_bounds = array<i64: 128, 128>}, {pipeline_mode = #tpu.pipeline_mode<synchronous>, transform_indices = @transform_4, window_bounds = array<i64: 128, 2>}, {pipeline_mode = #tpu.pipeline_mode<synchronous>, transform_indices = @transform_5, window_bounds = array<i64: 128, 2>}, {transform_indices = @transform_6, window_bounds = array<i64: 16, 128>}, {transform_indices = @transform_7, window_bounds = array<i64: 2, 1, 128>}]} {
    %c0 = arith.constant 0 : index
    %c0_0 = arith.constant 0 : index
    %0 = vector.load %arg1[%c0, %c0_0] : memref<16x128xf32, #tpu.memory_space<vmem>>, vector<16x128xf32>
    %c0_1 = arith.constant 0 : index
    %c0_2 = arith.constant 0 : index
    %1 = vector.load %arg2[%c0_1, %c0_2] : memref<16x128xf32, #tpu.memory_space<vmem>>, vector<16x128xf32>
    %c0_3 = arith.constant 0 : index
    %c0_4 = arith.constant 0 : index
    %2 = vector.load %arg4[%c0_3, %c0_4] : memref<128x128xf32, #tpu.memory_space<vmem>>, vector<128x128xf32>
    %cst = arith.constant dense<0.000000e+00> : vector<16x128xf32>
    %3 = tpu.matmul %1, %2, %cst {dimension_numbers = #tpu.dot_dimension_numbers<[1], [0], [0], [1], [0, 0, 1, 1], [], []>} : vector<16x128xf32>, vector<128x128xf32>, vector<16x128xf32> -> vector<16x128xf32>
    %c0_5 = arith.constant 0 : index
    %c0_6 = arith.constant 0 : index
    %4 = vector.load %arg5[%c0_5, %c0_6] : memref<128x2xf32, #tpu.memory_space<vmem>>, vector<128x2xf32>
    %cst_7 = arith.constant dense<0.000000e+00> : vector<16x2xf32>
    %5 = tpu.matmul %0, %4, %cst_7 {dimension_numbers = #tpu.dot_dimension_numbers<[1], [0], [0], [1], [0, 0, 1, 1], [], []>} : vector<16x128xf32>, vector<128x2xf32>, vector<16x2xf32> -> vector<16x2xf32>
    %c0_8 = arith.constant 0 : index
    %c0_9 = arith.constant 0 : index
    %6 = vector.load %arg6[%c0_8, %c0_9] : memref<128x2xf32, #tpu.memory_space<vmem>>, vector<128x2xf32>
    %cst_10 = arith.constant dense<0.000000e+00> : vector<16x2xf32>
    %7 = tpu.matmul %1, %6, %cst_10 {dimension_numbers = #tpu.dot_dimension_numbers<[1], [0], [0], [1], [0, 0, 1, 1], [], []>} : vector<16x128xf32>, vector<128x2xf32>, vector<16x2xf32> -> vector<16x2xf32>
    %8 = arith.addf %5, %7 : vector<16x2xf32>
    %c0_11 = arith.constant 0 : index
    %c0_12 = arith.constant 0 : index
    %c0_13 = arith.constant 0 : index
    %9 = vector.load %arg3[%c0_11, %c0_12, %c0_13] : memref<1x2x8xf32, #tpu.memory_space<vmem>>, vector<1x2x8xf32>
    %10 = vector.shape_cast %9 : vector<1x2x8xf32> to vector<2x8xf32>
    %11 = vector.shape_cast %8 : vector<16x2xf32> to vector<2x8x2xf32>
    %12 = vector.shape_cast %10 : vector<2x8xf32> to vector<2x8x1xf32>
    %13 = vector.broadcast %12 : vector<2x8x1xf32> to vector<2x8x2xf32>
    %14 = arith.addf %11, %13 : vector<2x8x2xf32>
    %cst_14 = arith.constant 0.000000e+00 : f32
    %15 = vector.broadcast %cst_14 : f32 to vector<2x8x2xf32>
    %16 = arith.cmpf oge, %14, %15 : vector<2x8x2xf32>
    %cst_15 = arith.constant 0.00999999977 : f32
    %17 = vector.broadcast %cst_15 : f32 to vector<2x8x2xf32>
    %18 = arith.mulf %17, %14 : vector<2x8x2xf32>
    %19 = arith.select %16, %14, %18 : vector<2x8x2xi1>, vector<2x8x2xf32>
    %cst_16 = arith.constant dense<0xFF800000> : vector<2x2xf32>
    %20 = vector.multi_reduction <maximumf>, %19, %cst_16 [1] : vector<2x8x2xf32> to vector<2x2xf32>
    %21 = vector.shape_cast %20 : vector<2x2xf32> to vector<2x1x2xf32>
    %22 = vector.broadcast %21 : vector<2x1x2xf32> to vector<2x8x2xf32>
    %23 = arith.subf %19, %22 : vector<2x8x2xf32>
    %24 = math.exp %23 : vector<2x8x2xf32>
    %cst_17 = arith.constant dense<0.000000e+00> : vector<2x2xf32>
    %25 = vector.multi_reduction <add>, %24, %cst_17 [1] : vector<2x8x2xf32> to vector<2x2xf32>
    %26 = vector.shape_cast %25 : vector<2x2xf32> to vector<2x1x2xf32>
    %27 = vector.broadcast %26 : vector<2x1x2xf32> to vector<2x8x2xf32>
    %28 = arith.divf %24, %27 : vector<2x8x2xf32>
    %29 = vector.shape_cast %28 : vector<2x8x2xf32> to vector<16x2xf32>
    %30 = vector.extract_strided_slice %29 {offsets = [0, 0], sizes = [16, 1], strides = [1, 1]} : vector<16x2xf32> to vector<16x1xf32>
    %31 = vector.broadcast %30 : vector<16x1xf32> to vector<16x128xf32>
    %32 = arith.mulf %31, %3 : vector<16x128xf32>
    %33 = math.tanh %32 : vector<16x128xf32>
    %c0_18 = arith.constant 0 : index
    %c0_19 = arith.constant 0 : index
    %34 = vector.load %arg7[%c0_18, %c0_19] : memref<16x128xf32, #tpu.memory_space<vmem>>, vector<16x128xf32>
    tpu.vector_store %arg7[%c0_18, %c0_19], %33 {strides = array<i32>} : memref<16x128xf32, #tpu.memory_space<vmem>>, vector<16x128xf32>,
    %35 = vector.extract_strided_slice %29 {offsets = [0, 1], sizes = [16, 1], strides = [1, 1]} : vector<16x2xf32> to vector<16x1xf32>
    %36 = vector.broadcast %35 : vector<16x1xf32> to vector<16x128xf32>
    %37 = arith.mulf %36, %3 : vector<16x128xf32>
    %38 = vector.shape_cast %37 : vector<16x128xf32> to vector<2x8x128xf32>
    %cst_20 = arith.constant dense<0.000000e+00> : vector<2x128xf32>
    %39 = vector.multi_reduction <add>, %38, %cst_20 [1] : vector<2x8x128xf32> to vector<2x128xf32>
    %40 = vector.shape_cast %39 : vector<2x128xf32> to vector<2x1x128xf32>
    %41 = math.tanh %40 : vector<2x1x128xf32>
    %c0_21 = arith.constant 0 : index
    %c0_22 = arith.constant 0 : index
    %c0_23 = arith.constant 0 : index
    %42 = vector.load %arg8[%c0_21, %c0_22, %c0_23] : memref<2x1x128xf32, #tpu.memory_space<vmem>>, vector<2x1x128xf32>
    tpu.vector_store %arg8[%c0_21, %c0_22, %c0_23], %41 {strides = array<i32>} : memref<2x1x128xf32, #tpu.memory_space<vmem>>, vector<2x1x128xf32>,
    return
  }
  func.func @transform_0(%arg0: i32) -> (i32, i32) {
    %c0_i32 = arith.constant 0 : i32
    %c0_i32_0 = arith.constant 0 : i32
    return %arg0, %c0_i32 : i32, i32
  }
  func.func @transform_1(%arg0: i32) -> (i32, i32) {
    %c0_i32 = arith.constant 0 : i32
    %c0_i32_0 = arith.constant 0 : i32
    return %arg0, %c0_i32 : i32, i32
  }
  func.func @transform_2(%arg0: i32) -> (i32, i32, i32) {
    %c0_i32 = arith.constant 0 : i32
    %c0_i32_0 = arith.constant 0 : i32
    %c0_i32_1 = arith.constant 0 : i32
    return %arg0, %c0_i32, %c0_i32_0 : i32, i32, i32
  }
  func.func @transform_3(%arg0: i32) -> (i32, i32) {
    %c0_i32 = arith.constant 0 : i32
    %c0_i32_0 = arith.constant 0 : i32
    %c0_i32_1 = arith.constant 0 : i32
    return %c0_i32, %c0_i32_0 : i32, i32
  }
  func.func @transform_4(%arg0: i32) -> (i32, i32) {
    %c0_i32 = arith.constant 0 : i32
    %c0_i32_0 = arith.constant 0 : i32
    %c0_i32_1 = arith.constant 0 : i32
    return %c0_i32, %c0_i32_0 : i32, i32
  }
  func.func @transform_5(%arg0: i32) -> (i32, i32) {
    %c0_i32 = arith.constant 0 : i32
    %c0_i32_0 = arith.constant 0 : i32
    %c0_i32_1 = arith.constant 0 : i32
    return %c0_i32, %c0_i32_0 : i32, i32
  }
  func.func @transform_6(%arg0: i32) -> (i32, i32) {
    %c0_i32 = arith.constant 0 : i32
    %c0_i32_0 = arith.constant 0 : i32
    return %arg0, %c0_i32 : i32, i32
  }
  func.func @transform_7(%arg0: i32) -> (i32, i32, i32) {
    %c0_i32 = arith.constant 0 : i32
    %c0_i32_0 = arith.constant 0 : i32
    %c0_i32_1 = arith.constant 0 : i32
    return %arg0, %c0_i32, %c0_i32_0 : i32, i32, i32
  }
}

</mosaic_0001>

<bundles_post_ra>
// kernel: tpu_custom_call.1
= control target key start
LH: loop header
LB: loop body
LE: loop exit
PB: predicated region body
PF: predicated region fallthrough
CT: control target
= control target key end

     0   :  { %13 = vsyncpa [#allocation3], 0  ;;  %s1685_s0 = inlined_call_operand.vmem [shape: f32[32,128], index: 0, kind: input, shape index: {}]   ;;  %s1686_s1 = inlined_call_operand.vmem [shape: f32[32,128], index: 1, kind: input, shape index: {}]   ;;  %s1687_s2 = inlined_call_operand.vmem [shape: f32[2,2,8], index: 2, kind: input, shape index: {}]   ;;  %s1688_s3 = inlined_call_operand.vmem [shape: f32[128,128], index: 3, kind: input, shape index: {}]   ;;  %s1689_s4 = inlined_call_operand.vmem [shape: f32[128,2], index: 4, kind: input, shape index: {}]   ;;  %s1690_s5 = inlined_call_operand.vmem [shape: f32[128,2], index: 5, kind: input, shape index: {}]   ;;  %s1691_s6 = inlined_call_operand.hbm [shape: f32[32,128], index: 6, kind: output, shape index: {0}]   ;;  %s1692_s7 = inlined_call_operand.hbm [shape: f32[4,1,128], index: 7, kind: output, shape index: {1}]  }
   0x1   :  { %15 = vsyncpa [#allocation3 + $0x1], 0 }
   0x2   :  { %16 = vsyncpa [#allocation5], 0 }
   0x3   :  { %18 = vsyncpa [#allocation5 + $0x1], 0  ;;  %s1357_s24 = smov 0   ;;  %s1359_s25 = smov 0  }
   0x4   :  { %s1361_s26 = smov 0   ;;  %s1363_s27 = smov 0  }
   0x5 LB: > { %s1378_s28 = sadd.s32 4294967295, %s1307_s27   ;;  %s865_s29 = sadd.s32 4294967294, %s1307_s27   ;;  %s1307_s27 = sphi %s1363_s27, %s1699_s27   ;;  %s1303_s26 = sphi %s1361_s26, %s1698_s26   ;;  %s1299_s25 = sphi %s1359_s25, %s1697_s25   ;;  %s1295_s24 = sphi %s1357_s24, %s1696_s24  }
   0x6   : > { %s1382_s30 = sadd.s32 1, %s1307_s27   ;;  %s172_s8 = sadd.s32 1, %s1303_s26 }
   0x7   : > { %s169_s9 = ssub.s32 %s1307_s27, %s1382_s30  ;;  %p182_p0 = scmp.ne.s32.totalorder %s1303_s26, %s1299_s25 }
   0x8   : > { %p170_p1 = scmp.eq.s32.totalorder %s169_s9, 0  ;;  %p183_p2 = scmp.eq.s32.totalorder %s1378_s28, 1 }
   0x9   : > { %p188_p3 = scmp.ne.s32.totalorder %s1299_s25, %s1295_s24  ;;  %p189_p4 = scmp.eq.s32.totalorder %s865_s29, 1 }
   0xa   : > { %s1393_s10 = scalar_select %p170_p1, %s1303_s26, %s172_s8  }
   0xb   : > { %p1395_p5 = por %p183_p2, %p182_p0  ;;  %p1399_p6 = por %p189_p4, %p188_p3 }
   0xc   : > { %p868_p7 = scmp.ge.s32.totalorder %s1307_s27, 1  ;;  %p267_p8 = scmp.lt.s32.totalorder %s1307_s27, 3 }
   0xe   : > { %p268_p9 = pnand %p868_p7, %p267_p8 }
   0xf   : > { %v442_v0 = vld [vmem:[%s1690_s5] sm:$0xff] (!%p268_p9)  ;;  %v443_v1 = vld [vmem:[%s1690_s5 + $0x8] sm:$0xff] (!%p268_p9)  ;;  %v444_v2 = vld [vmem:[%s1690_s5 + $0x10] sm:$0xff] (!%p268_p9)  ;;  %s871_s19 = sshll.u32 (!%p268_p9), %s1378_s28, 1  ;;  %p325_p10 = scmp.lt.s32.totalorder (!%p268_p9), %s1378_s28, 1  ;;  %v609_v5 = vlaneseq (!%p268_p9)  ;;  %vm631_vm1 = vcmask (!%p268_p9), 15360  }
  0x10   : > { %271 = sbr.rel (%p268_p9) target bundleno = 544 (0x220), region = 44  ;;  %v1077_v3 = vpack.c.bf16 (!%p268_p9), %v443_v1, %v442_v0  ;;  %v445_v4 = vld [vmem:[%s1690_s5 + $0x18] sm:$0xff] (!%p268_p9)  ;;  %p314_p11 = scmp.lt.s32.totalorder (!%p268_p9), %s871_s19, 3  ;;  %v446_v7 = vld [vmem:[%s1690_s5 + $0x20] sm:$0xff] (!%p268_p9)  ;;  %v447_v8 = vld [vmem:[%s1690_s5 + $0x28] sm:$0xff] (!%p268_p9) }
  0x11   : > { %v1081_v6 = vpack.c.bf16 (!%p268_p9), %v445_v4, %v444_v2  ;;  %v1085_v9 = vpack.c.bf16 (!%p268_p9), %v447_v8, %v446_v7  ;;  %v610_v10 = vshrl.u32 (!%p268_p9), %v609_v5, 7  ;;  %v448_v11 = vld [vmem:[%s1690_s5 + $0x30] sm:$0xff] (!%p268_p9)  ;;  %v449_v12 = vld [vmem:[%s1690_s5 + $0x38] sm:$0xff] (!%p268_p9)  ;;  %v450_v16 = vld [vmem:[%s1690_s5 + $0x40] sm:$0xff] (!%p268_p9)  ;;  %s884_s16 = sshll.u32 (!%p268_p9), %s1378_s28, 8 }
  0x12   : > { %1078 = vmatprep.subr.bf16.mxu1 (!%p268_p9), %v1077_v3  ;;  %v1089_v14 = vpack.c.bf16 (!%p268_p9), %v449_v12, %v448_v11  ;;  %v451_v17 = vld [vmem:[%s1690_s5 + $0x48] sm:$0xff] (!%p268_p9)  ;;  %v335_v20 = vld [vmem:[%s1688_s3] sm:$0xff] (!%p268_p9)  ;;  %v452_v23 = vld [vmem:[%s1690_s5 + $0x50] sm:$0xff] (!%p268_p9)  ;;  %s1599_s23 = scalar_lea.hbm (!%p268_p9), %s1691_s6, %s884_s16 }
  0x13   : > { %1080 = vmatpush3.bf16.msra.mxu1 (!%p268_p9), %v1077_v3  ;;  %v611_v15 = vsub.s32 (!%p268_p9), 0, %v610_v10  ;;  %v618_v18 = vsub.s32 (!%p268_p9), 1, %v610_v10  ;;  %v336_v21 = vld [vmem:[%s1688_s3 + $0x8] sm:$0xff] (!%p268_p9)  ;;  %v1093_v22 = vpack.c.bf16 (!%p268_p9), %v451_v17, %v450_v16  ;;  %v337_v26 = vld [vmem:[%s1688_s3 + $0x10] sm:$0xff] (!%p268_p9)  ;;  %v338_v27 = vld [vmem:[%s1688_s3 + $0x18] sm:$0xff] (!%p268_p9) }
  0x14   : > { %1082 = vmatprep.subr.bf16.mxu1 (!%p268_p9), %v1081_v6  ;;  %v1045_v25 = vpack.c.bf16 (!%p268_p9), %v336_v21, %v335_v20  ;;  %v453_v28 = vld [vmem:[%s1690_s5 + $0x58] sm:$0xff] (!%p268_p9)  ;;  %v1049_v29 = vpack.c.bf16 (!%p268_p9), %v338_v27, %v337_v26  ;;  %v339_v30 = vld [vmem:[%s1688_s3 + $0x20] sm:$0xff] (!%p268_p9)  ;;  %v340_v31 = vld [vmem:[%s1688_s3 + $0x28] sm:$0xff] (!%p268_p9)  ;;  %v1310_v20 = vmov (!%p268_p9), 0  }
  0x15   : > { %v1097_v33 = vpack.c.bf16 (!%p268_p9), %v453_v28, %v452_v23  ;;  %v454_v34 = vld [vmem:[%s1690_s5 + $0x60] sm:$0xff] (!%p268_p9)  ;;  %v1053_v35 = vpack.c.bf16 (!%p268_p9), %v340_v31, %v339_v30  ;;  %v455_v36 = vld [vmem:[%s1690_s5 + $0x68] sm:$0xff] (!%p268_p9)  ;;  %v341_v37 = vld [vmem:[%s1688_s3 + $0x30] sm:$0xff] (!%p268_p9)  ;;  %1194 = vset.pattern.permute.xlu0 (!%p268_p9), %v1310_v20 }
  0x16   : > { %1046 = vmatprep.subr.bf16.mxu0 (!%p268_p9), %v1045_v25  ;;  %v342_v38 = vld [vmem:[%s1688_s3 + $0x38] sm:$0xff] (!%p268_p9)  ;;  %v1101_v39 = vpack.c.bf16 (!%p268_p9), %v455_v36, %v454_v34  ;;  %v456_v40 = vld [vmem:[%s1690_s5 + $0x70] sm:$0xff] (!%p268_p9)  ;;  %v343_v43 = vld [vmem:[%s1688_s3 + $0x40] sm:$0xff] (!%p268_p9) }
  0x17   : > { %s326_s9 = scalar_select %p325_p10, %s1378_s28, 1  ;;  %1084 = vmatpush3.bf16.msra.mxu1 %v1081_v6  ;;  %1048 = vmatpush3.bf16.msra.mxu0 %v1045_v25  ;;  %v1057_v41 = vpack.c.bf16 %v342_v38, %v341_v37  ;;  %v457_v42 = vld [vmem:[%s1690_s5 + $0x78] sm:$0xff]  ;;  %v344_v44 = vld [vmem:[%s1688_s3 + $0x48] sm:$0xff]  ;;  %v426_v46 = vld [vmem:[%s1689_s4] sm:$0xff] }
  0x18   : > { %s1701_s19 = smov (!%p314_p11, %s871_s19), 3  ;;  %1086 = vmatprep.subr.bf16.mxu1 %v1085_v9  ;;  %1050 = vmatprep.subr.bf16.mxu0 %v1049_v29  ;;  %v1105_v45 = vpack.c.bf16 %v457_v42, %v456_v40  ;;  %v1061_v47 = vpack.c.bf16 %v344_v44, %v343_v43  ;;  %v427_v48 = vld [vmem:[%s1689_s4 + $0x8] sm:$0xff]  ;;  %v345_v49 = vld [vmem:[%s1688_s3 + $0x50] sm:$0xff]  ;;  %v346_v50 = vld [vmem:[%s1688_s3 + $0x58] sm:$0xff] }
  0x19   : > { %s872_s13 = sshll.u32 %s1701_s19, 3  ;;  %s875_s22 = sshll.u32 %s326_s9, 1  ;;  %v1109_v51 = vpack.c.bf16 %v427_v48, %v426_v46  ;;  %v1065_v52 = vpack.c.bf16 %v346_v50, %v345_v49  ;;  %v428_v53 = vld [vmem:[%s1689_s4 + $0x10] sm:$0xff]  ;;  %v429_v54 = vld [vmem:[%s1689_s4 + $0x18] sm:$0xff]  ;;  %v347_v55 = vld [vmem:[%s1688_s3 + $0x60] sm:$0xff] }
  0x1a   : > { %s1440_s21 = scalar_lea.vmem %s1686_s1, %s872_s13  ;;  %s328_s8 = scalar_lea.vmem %s1687_s2, %s875_s22  ;;  %v348_v56 = vld [vmem:[%s1688_s3 + $0x68] sm:$0xff]  ;;  %v1113_v58 = vpack.c.bf16 %v429_v54, %v428_v53  ;;  %v430_v60 = vld [vmem:[%s1689_s4 + $0x20] sm:$0xff]  ;;  %v349_v63 = vld [vmem:[%s1688_s3 + $0x70] sm:$0xff] }
  0x1b   : > { %v333_v13 = vld [vmem:[%s1440_s21] sm:$0xff]  ;;  %1088 = vmatpush3.bf16.msra.mxu1 %v1085_v9  ;;  %1052 = vmatpush3.bf16.msra.mxu0 %v1049_v29  ;;  %s1523_s20 = scalar_lea.vmem %s1685_s0, %s872_s13  ;;  %v334_v57 = vld [vmem:[%s1440_s21 + $0x8] sm:$0xff]  ;;  %v1069_v62 = vpack.c.bf16 %v348_v56, %v347_v55  ;;  %v350_v0 = vld [vmem:[%s1688_s3 + $0x78] sm:$0xff]  ;;  %s885_s22 = sshll.u32 %s1378_s28, 5 }
  0x1c   : > { %1007 = vmatprep.mubr.f32.mxu1 %v333_v13  ;;  %972 = vmatprep.mubr.f32.mxu0 %v333_v13  ;;  %v608_v19 = vld [vmem:[%s328_s8] sm:$0x3]  ;;  %v431_v61 = vld [vmem:[%s1689_s4 + $0x28] sm:$0xff]  ;;  %v432_v2 = vld [vmem:[%s1689_s4 + $0x30] sm:$0xff]  ;;  %v1073_v4 = vpack.c.bf16 %v350_v0, %v349_v63 }
  0x1d   : > { %1090 = vmatprep.subr.bf16.mxu1 %v1089_v14  ;;  %v612_v24 = vrot.slane %v608_v19, %v611_v15  ;;  %v619_v32 = vrot.slane %v608_v19, %v618_v18  ;;  %1054 = vmatprep.subr.bf16.mxu0 %v1053_v35  ;;  %v331_v59 = vld [vmem:[%s1523_s20] sm:$0xff]  ;;  %v1117_v1 = vpack.c.bf16 %v431_v61, %v430_v60  ;;  %v433_v3 = vld [vmem:[%s1689_s4 + $0x38] sm:$0xff]  ;;  %v435_v7 = vld [vmem:[%s1689_s4 + $0x48] sm:$0xff]  ;;  %v1309_v19 = vmov 1  }
  0x1e   : > { %v1121_v5 = vpack.c.bf16 %v433_v3, %v432_v2  ;;  %v434_v6 = vld [vmem:[%s1689_s4 + $0x40] sm:$0xff]  ;;  %v436_v9 = vld [vmem:[%s1689_s4 + $0x50] sm:$0xff]  ;;  %v437_v10 = vld [vmem:[%s1689_s4 + $0x58] sm:$0xff]  ;;  %1193 = vset.pattern.permute.xlu1 %v1309_v19 }
  0x1f   : > { %614 = vbcast.lane.b32.xlu0 %v612_v24, 256  ;;  %1092 = vmatpush3.bf16.msra.mxu1 %v1089_v14  ;;  %v1125_v8 = vpack.c.bf16 %v435_v7, %v434_v6  ;;  %v1129_v11 = vpack.c.bf16 %v437_v10, %v436_v9  ;;  %v438_v12 = vld [vmem:[%s1689_s4 + $0x60] sm:$0xff]  ;;  %v439_v13 = vld [vmem:[%s1689_s4 + $0x68] sm:$0xff]  ;;  %v440_v15 = vld [vmem:[%s1689_s4 + $0x70] sm:$0xff] }
  0x20   : > { %1094 = vmatprep.subr.bf16.mxu1 %v1093_v22  ;;  %1056 = vmatpush3.bf16.msra.mxu0 %v1053_v35  ;;  %v1133_v14 = vpack.c.bf16 %v439_v13, %v438_v12  ;;  %v441_v16 = vld [vmem:[%s1689_s4 + $0x78] sm:$0xff]  ;;  %v332_v18 = vld [vmem:[%s1523_s20 + $0x8] sm:$0xff]  ;;  %s1590_s20 = sand.u32 1, %s1299_s25  }
  0x21   : > { %1058 = vmatprep.subr.bf16.mxu0 %v1057_v41  ;;  %v1137_v17 = vpack.c.bf16 %v441_v16, %v440_v15  ;;  %s869_s13 = sshll.u32 %s1590_s20, 4  ;;  %s870_s21 = sshll.u32 %s1590_s20, 1 }
  0x22   : > { %s305_s8 = scalar_lea.vmem [#allocation2], %s869_s13  ;;  %s1604_s29 = scalar_lea.vmem [#allocation4], %s870_s21 }
  0x23   : > { %621 = vbcast.lane.b32.xlu0 %v619_v32, 256  ;;  %1096 = vmatpush3.bf16.msra.mxu1 %v1093_v22  ;;  %s731_s17 = sshll.u32 %s305_s8, 4  ;;  %s713_s19 = scalar_lea.sflag [#allocation3], %s1590_s20  ;;  %s1601_s17 = int_to_ptr.vmem [resolvable:$true] %s731_s17 }
  0x24   : > { %1098 = vmatprep.subr.bf16.mxu1 %v1097_v33  ;;  %1060 = vmatpush3.bf16.msra.mxu0 %v1057_v41  ;;  %s1213_s15 = scalar_lea.vmem %s1601_s17, 256  ;;  %s1311_s13 = smov [#allocation2]  }
  0x25   : > { %1062 = vmatprep.subr.bf16.mxu0 %v1061_v47  ;;  %p1214_p12 = scmp.ne.s32.totalorder %s1601_s17, %s1213_s15  ;;  %s1217_s16 = sshll.u32 %s1311_s13, 4  ;;  %s1218_s16 = int_to_ptr.vmem [resolvable:$false] %s1217_s16 }
  0x26   : > { %s1219_s9 = scalar_lea.vmem %s1218_s16, 512  ;;  %p1220_p1 = scmp.lt.s32.totalorder %s1601_s17, %s1218_s16 }
  0x27   : > { %1100 = vmatpush3.bf16.msra.mxu1 %v1097_v33  ;;  %p1215_p13 = pnand %p1214_p12, %p1395_p5  ;;  %p1221_p2 = scmp.lt.s32.totalorder %s1219_s9, %s1213_s15 }
  0x28   : > { %1102 = vmatprep.subr.bf16.mxu1 %v1101_v39  ;;  %1064 = vmatpush3.bf16.msra.mxu0 %v1061_v47 }
  0x29   : > { %1066 = vmatprep.subr.bf16.mxu0 %v1065_v52  ;;  %p1216_p0 = pneg %p1215_p13  ;;  %p1222_p3 = por %p1221_p2, %p1220_p1 }
  0x2b   : > { %1104 = vmatpush3.bf16.msra.mxu1 %v1101_v39  ;;  %p1223_p4 = pnand %p1222_p3, %p1216_p0 }
  0x2c   : > { %1106 = vmatprep.subr.bf16.mxu1 %v1105_v45  ;;  %1068 = vmatpush3.bf16.msra.mxu0 %v1065_v52 }
  0x2d   : > { %1070 = vmatprep.subr.bf16.mxu0 %v1069_v62 }
  0x2f   : > { %1108 = vmatpush3.bf16.msra.mxu1 %v1105_v45 }
  0x30   : > { %1110 = vmatprep.subr.bf16.mxu1 %v1109_v51  ;;  %1072 = vmatpush3.bf16.msra.mxu0 %v1069_v62 }
  0x31   : > { %1074 = vmatprep.subr.bf16.mxu0 %v1073_v4 }
  0x32   : > { %1008 = vmatmul.mubr.f32.vlgmr.msra.gmra.mrb[0].mxu1 %v334_v57 }
  0x33   : > { %1112 = vmatpush3.bf16.msra.mxu1 %v1109_v51  ;;  %1042 = vmatprep.mubr.f32.mxu1 %v331_v59 }
  0x34   : > { %1114 = vmatprep.subr.bf16.mxu1 %v1113_v58  ;;  %1076 = vmatpush3.bf16.msra.mxu0 %v1073_v4 }
  0x37   : > { %1116 = vmatpush3.bf16.msra.mxu1 %v1113_v58  ;;  %973 = vmatmul.mubr.f32.vlgmr.msra.gmra.mrb[0].mxu0 %v334_v57 }
  0x38   : > { %1118 = vmatprep.subr.bf16.mxu1 %v1117_v1 }
  0x3b   : > { %1120 = vmatpush3.bf16.msra.mxu1 %v1117_v1 }
  0x3c   : > { %1122 = vmatprep.subr.bf16.mxu1 %v1121_v5 }
  0x3f   : > { %1124 = vmatpush3.bf16.msra.mxu1 %v1121_v5 }
  0x40   : > { %1126 = vmatprep.subr.bf16.mxu1 %v1125_v8 }
  0x43   : > { %1128 = vmatpush3.bf16.msra.mxu1 %v1125_v8 }
  0x44   : > { %1130 = vmatprep.subr.bf16.mxu1 %v1129_v11 }
  0x47   : > { %1132 = vmatpush3.bf16.msra.mxu1 %v1129_v11 }
  0x48   : > { %1134 = vmatprep.subr.bf16.mxu1 %v1133_v14 }
  0x4b   : > { %1136 = vmatpush3.bf16.msra.mxu1 %v1133_v14 }
  0x4c   : > { %1138 = vmatprep.subr.bf16.mxu1 %v1137_v17 }
  0x4f   : > { %1140 = vmatpush3.bf16.msra.mxu1 %v1137_v17 }
  0x52   : > { %1043 = vmatmul.mubr.f32.vlgmr.msra.gmra.mrb[0].mxu1 %v332_v18 }
  0x91   : > { %v615_v23 = vpop.permute.xlu0 %614 }
  0x95   : > { %v622_v24 = vpop.permute.xlu0 %621 }
 0x10a   : > { %v1577_v21 = vpop.f32.mrb[0].mxu0 }
 0x10b   : > { %v1579_v22 = vpop.f32.mrb[1].mxu0 }
 0x125   : > { %v1044_v25 = vpop.f32.mrb[0].mxu1 }
 0x126   : > { %v624_v26 = vadd.f32 %v1044_v25, %v622_v24  ;;  %v599_v27 = vpop.f32.mrb[1].mxu1 }
 0x127   : > { %v623_v28 = vadd.f32 %v615_v23, %v599_v27 }
 0x128   : > { %vm626_vm0 = vcmp.ge.f32.partialorder %v624_v26, 0.0  ;;  %v628_v29 = vmul.f32 0.01, %v624_v26 }
 0x129   : > { %vm625_vm2 = vcmp.ge.f32.partialorder %v623_v28, 0.0  ;;  %v627_v30 = vmul.f32 0.01, %v623_v28 }
 0x12a   : > { %v630_v31 = vsel %vm626_vm0, %v624_v26, %v628_v29 }
 0x12b   : > { %v639_v32 = vsel %vm631_vm1, %v630_v31, -inf  ;;  %v629_v33 = vsel %vm625_vm2, %v623_v28, %v627_v30 }
 0x12c   : > { %v640_v34 = vrot.slane %v639_v32, 4  ;;  %v632_v35 = vsel %vm631_vm1, %v629_v33, -inf }
 0x12d   : > { %v633_v36 = vrot.slane %v632_v35, 4 }
 0x12e   : > { %v641_v37 = vmax.f32 %v639_v32, %v640_v34 }
 0x12f   : > { %v634_v38 = vmax.f32 %v632_v35, %v633_v36 }
 0x130   : > { %v642_v39 = vrot.slane %v641_v37, 2 }
 0x131   : > { %v635_v40 = vrot.slane %v634_v38, 2 }
 0x132   : > { %v643_v41 = vmax.f32 %v641_v37, %v642_v39 }
 0x133   : > { %v636_v42 = vmax.f32 %v634_v38, %v635_v40 }
 0x134   : > { %v644_v43 = vrot.slane %v643_v41, 1 }
 0x135   : > { %v637_v44 = vrot.slane %v636_v42, 1 }
 0x136   : > { %v645_v45 = vmax.f32 %v643_v41, %v644_v43 }
 0x137   : > { %v638_v46 = vmax.f32 %v636_v42, %v637_v44 }
 0x138   : > { %v647_v47 = vsub.f32 %v630_v31, %v645_v45 }
 0x139   : > { %v646_v48 = vsub.f32 %v629_v33, %v638_v46 }
 0x13a   : > { %v650_v49 = vmul.f32 1.442695, %v647_v47 }
 0x13b   : > { %v648_v50 = vmul.f32 1.442695, %v646_v48 }
 0x13c   : > { %1197 = vpow2.f32 %v650_v49 }
 0x13d   : > { %1199 = vpow2.f32 %v648_v50 }
 0x146   : > { %v1198_v51 = vpop.eup %1197 }
 0x147   : > { %v1200_v52 = vpop.eup %1199  ;;  %v659_v53 = vsel %vm631_vm1, %v1198_v51, 0.0 }
 0x148   : > { %v660_v54 = vrot.slane %v659_v53, 4  ;;  %v652_v55 = vsel %vm631_vm1, %v1200_v52, 0.0 }
 0x149   : > { %v653_v56 = vrot.slane %v652_v55, 4 }
 0x14a   : > { %v661_v57 = vadd.f32 %v660_v54, %v659_v53 }
 0x14b   : > { %v654_v58 = vadd.f32 %v653_v56, %v652_v55 }
 0x14c   : > { %v662_v59 = vrot.slane %v661_v57, 2 }
 0x14d   : > { %v655_v60 = vrot.slane %v654_v58, 2 }
 0x14e   : > { %v663_v61 = vadd.f32 %v662_v59, %v661_v57 }
 0x14f   : > { %v656_v62 = vadd.f32 %v655_v60, %v654_v58 }
 0x150   : > { %v664_v63 = vrot.slane %v663_v61, 1 }
 0x151   : > { %v657_v0 = vrot.slane %v656_v62, 1 }
 0x152   : > { %v665_v2 = vadd.f32 %v664_v63, %v663_v61 }
 0x153   : > { %v658_v1 = vadd.f32 %v657_v0, %v656_v62 }
 0x155   : > { %1201 = vrcp.f32 %v658_v1 }
 0x156   : > { %1203 = vrcp.f32 %v665_v2 }
 0x15f   : > { %v1202_v3 = vpop.eup %1201 }
 0x160   : > { %v667_v4 = vmul.f32 %v1202_v3, %v1200_v52  ;;  %v1204_v5 = vpop.eup %1203 }
 0x161   : > { %v669_v6 = vmul.f32 %v1204_v5, %v1198_v51 }
 0x162   : > { %672 = vperm.xlu0 %1194, %v667_v4   ;;  %687 = vperm.xlu1 %1193, %v667_v4  }
 0x166   : > { %691 = vperm.xlu1 %1193, %v669_v6   ;;  %1196 = vset.pattern.permute.xlu0 %v1309_v19 }
 0x16a   : > { %1195 = vset.pattern.permute.xlu1 %v1310_v20 }
 0x16b   : > { %677 = vperm.xlu1 %1195, %v669_v6  }
 0x1e1   : > { %v673_v7 = vpop.permute.xlu0 %672  ;;  %v688_v8 = vpop.permute.xlu1 %687 }
 0x1e2   : > { %v680_v9 = vmul.f32 %v673_v7, %v1579_v22  ;;  %v694_v10 = vmul.f32 %v688_v8, %v1579_v22 }
 0x1e4   : > { %1205 = vtanh.f32 %v680_v9  ;;  %v696_v11 = vrot.slane %v694_v10, 4 }
 0x1e5   : > { %v692_v12 = vpop.permute.xlu1 %691 }
 0x1e6   : > { %v697_v13 = vadd.f32 %v696_v11, %v694_v10  ;;  %v695_v14 = vmul.f32 %v1577_v21, %v692_v12 }
 0x1e8   : > { %v698_v15 = vrot.slane %v697_v13, 2  ;;  %v702_v16 = vrot.slane %v695_v14, 4 }
 0x1ea   : > { %v699_v17 = vadd.f32 %v698_v15, %v697_v13  ;;  %v703_v18 = vadd.f32 %v702_v16, %v695_v14  ;;  %v678_v19 = vpop.permute.xlu1 %677 }
 0x1eb   : > { %v681_v20 = vmul.f32 %v1577_v21, %v678_v19 }
 0x1ec   : > { %v700_v22 = vrot.slane %v699_v17, 1  ;;  %v704_v23 = vrot.slane %v703_v18, 2 }
 0x1ed   : > { %1207 = vtanh.f32 %v681_v20 }
 0x1ee   : > { %v1206_v24 = vpop.eup %1205  ;;  %v701_v25 = vadd.f32 %v700_v22, %v699_v17  ;;  %v705_v26 = vadd.f32 %v704_v23, %v703_v18 }
 0x1ef   : > { %684 = vst [vmem:[%s305_s8] sm:$0xff] %v1206_v24 }
 0x1f0   : > { %1209 = vtanh.f32 %v701_v25  ;;  %v706_v27 = vrot.slane %v705_v26, 1 }
 0x1f2   : > { %v707_v28 = vadd.f32 %v706_v27, %v705_v26 }
 0x1f4   : > { %1211 = vtanh.f32 %v707_v28 }
 0x1f7   : > { %v1208_v21 = vpop.eup %1207 }
 0x1f8   : > { %685 = vst [vmem:[%s305_s8 + $0x8] sm:$0xff] %v1208_v21 }
 0x1f9   : > { %1226 = shalt.err (!%p1223_p4)
}
 0x1fa   : > { %s1227_s8 = scalar_lea.hbm %s1599_s23, 256  ;;  %s1231_s13 = scalar_lea.hbm %s1691_s6, 512 }
 0x1fb   : > { %p1228_p7 = scmp.ne.s32.totalorder %s1599_s23, %s1227_s8  ;;  %p1232_p10 = scmp.lt.u32.totalorder %s1599_s23, %s1691_s6 }
 0x1fc   : > { %p1233_p11 = scmp.lt.u32.totalorder %s1231_s13, %s1227_s8  ;;  %p1235_p13 = scmp.lt.u32.totalorder %s1227_s8, %s1599_s23 }
 0x1fd   : > { %p1229_p8 = pnand %p1228_p7, %p1395_p5 }
 0x1fe   : > { %p1234_p12 = por %p1233_p11, %p1232_p10 }
 0x1ff   : > { %p1230_p9 = pneg %p1229_p8 }
 0x200   : > { %p1236_p0 = por %p1235_p13, %p1234_p12 }
 0x202   : > { %p1237_p1 = pnand %p1236_p0, %p1230_p9 }
 0x204   : > { %1240 = shalt.err (!%p1237_p1)
}
 0x205   : > { %s1312_s15 = smov 128   ;;  %s1313_s9 = smov 8   ;;  %v1210_v29 = vpop.eup %1209 }
 0x206   : > { %1143 = dma.vmem_to_hbm [thread:$0]  (%p1395_p5), %s1601_s17, 256, %s1599_s23, %s713_s19, %s1312_s15, %s1312_s15, %s1313_s9   ;;  %v1212_v30 = vpop.eup %1211 }
 0x207   : > { %710 = vst [vmem:[%s1604_s29] sm:$0x1] %v1210_v29  ;;  %s1637_s21 = scalar_lea.hbm %s1692_s7, %s885_s22  ;;  %s1695_s18 = sshll.u32 %s1604_s29, 4  ;;  %711 = vst [vmem:[%s1604_s29 + $0x1] sm:$0x1] %v1212_v30  ;;  %s1641_s18 = int_to_ptr.vmem [resolvable:$true] %s1695_s18 }
 0x208   : > { %s718_s13 = scalar_lea.sflag [#allocation5], %s1590_s20  ;;  %s1241_s16 = scalar_lea.vmem %s1641_s18, 32 }
 0x209   : > { %p1242_p2 = scmp.ne.s32.totalorder %s1641_s18, %s1241_s16  ;;  %s1314_s28 = smov [#allocation4]  }
 0x20a   : > { %s1245_s17 = sshll.u32 %s1314_s28, 4  ;;  %s1246_s17 = int_to_ptr.vmem [resolvable:$false] %s1245_s17 }
 0x20b   : > { %p1243_p3 = pnand %p1242_p2, %p1395_p5  ;;  %s1247_s23 = scalar_lea.vmem %s1246_s17, 64 }
 0x20c   : > { %p1248_p7 = scmp.lt.s32.totalorder %s1641_s18, %s1246_s17  ;;  %p1249_p8 = scmp.lt.s32.totalorder %s1247_s23, %s1241_s16 }
 0x20d   : > { %p1244_p4 = pneg %p1243_p3 }
 0x20e   : > { %p1250_p9 = por %p1249_p8, %p1248_p7 }
 0x210   : > { %p1251_p10 = pnand %p1250_p9, %p1244_p4 }
 0x212   : > { %1254 = shalt.err (!%p1251_p10)
}
 0x213   : > { %s1255_s22 = scalar_lea.hbm %s1637_s21, 32  ;;  %s1259_s15 = scalar_lea.hbm %s1692_s7, 64 }
 0x214   : > { %p1256_p11 = scmp.ne.s32.totalorder %s1637_s21, %s1255_s22  ;;  %p1260_p0 = scmp.lt.u32.totalorder %s1637_s21, %s1692_s7 }
 0x215   : > { %p1261_p1 = scmp.lt.u32.totalorder %s1259_s15, %s1255_s22  ;;  %p1263_p3 = scmp.lt.u32.totalorder %s1255_s22, %s1637_s21 }
 0x216   : > { %p1257_p12 = pnand %p1256_p11, %p1395_p5 }
 0x217   : > { %p1262_p2 = por %p1261_p1, %p1260_p0 }
 0x218   : > { %p1258_p13 = pneg %p1257_p12 }
 0x219   : > { %p1264_p4 = por %p1263_p3, %p1262_p2 }
 0x21b   : > { %p1265_p7 = pnand %p1264_p4, %p1258_p13 }
 0x21d   : > { %1268 = shalt.err (!%p1265_p7)
}
 0x21e   : > { %s1315_s8 = smov 16   ;;  %s1316_s16 = smov 1  }
 0x21f   : > { %1144 = dma.vmem_to_hbm [thread:$0]  (%p1395_p5), %s1641_s18, 32, %s1637_s21, %s718_s13, %s1315_s8, %s1315_s8, %s1316_s16  }
 0x220 PF: > { %p1154_p8 = scmp.ge.s32.totalorder %s1307_s27, 2  ;;  %s762_s28 = sand.u32 1, %s1295_s24  }
 0x221   : > { %s763_s17 = scalar_lea.sflag [#allocation3], %s762_s28 }
 0x222   : > { %p1148_p9 = pnand %p1154_p8, %p1399_p6 }
 0x224   : > { %1286 = dma.done.wait (!%p1148_p9), %s763_s17, 256  }
 0x225   : > { %1288 = vsyncadd (!%p1148_p9), %s763_s17, 4294967040  ;;  %s772_s23 = scalar_lea.sflag [#allocation5], %s762_s28 }
 0x226   : > { %1290 = dma.done.wait (!%p1148_p9), %s772_s23, 32  }
 0x227   : > { %1292 = vsyncadd (!%p1148_p9), %s772_s23, 4294967264  ;;  %p21_p5 = scmp.ge.s32.totalorder %s1382_s30, 4   ;;  %s1696_s24 = smov %s1299_s25 }
 0x228   : > { %s1697_s25 = smov %s1303_s26  ;;  %s1698_s26 = smov %s1393_s10 }
 0x229   : > { %s1699_s27 = smov %s1382_s30  ;;  %23 = sbr.rel (!%p21_p5) target bundleno = 5 (0x5), region = 102 }
 0x230   :  { %777 = vsyncpa [#allocation3], 1 }
 0x231   :  { %779 = vsyncpa [#allocation3 + $0x1], 1 }
 0x232   :  { %780 = vsyncpa [#allocation5], 1 }
 0x233   :  { %782 = vsyncpa [#allocation5 + $0x1], 1 }

// kernel: tpu_custom_call.1
= control target key start
LH: loop header
LB: loop body
LE: loop exit
PB: predicated region body
PF: predicated region fallthrough
CT: control target
= control target key end

     0   :  { %13 = vsyncpa [#allocation3], 0  ;;  %s1685_s0 = inlined_call_operand.vmem [shape: f32[32,128], index: 0, kind: input, shape index: {}]   ;;  %s1686_s1 = inlined_call_operand.vmem [shape: f32[32,128], index: 1, kind: input, shape index: {}]   ;;  %s1687_s2 = inlined_call_operand.vmem [shape: f32[2,2,8], index: 2, kind: input, shape index: {}]   ;;  %s1688_s3 = inlined_call_operand.vmem [shape: f32[128,128], index: 3, kind: input, shape index: {}]   ;;  %s1689_s4 = inlined_call_operand.vmem [shape: f32[128,2], index: 4, kind: input, shape index: {}]   ;;  %s1690_s5 = inlined_call_operand.vmem [shape: f32[128,2], index: 5, kind: input, shape index: {}]   ;;  %s1691_s6 = inlined_call_operand.hbm [shape: f32[32,128], index: 6, kind: output, shape index: {0}]   ;;  %s1692_s7 = inlined_call_operand.hbm [shape: f32[4,1,128], index: 7, kind: output, shape index: {1}]  }
   0x1   :  { %15 = vsyncpa [#allocation3 + $0x1], 0 }
   0x2   :  { %16 = vsyncpa [#allocation5], 0 }
   0x3   :  { %18 = vsyncpa [#allocation5 + $0x1], 0  ;;  %s1357_s24 = smov 0   ;;  %s1359_s25 = smov 0  }
   0x4   :  { %s1361_s26 = smov 0   ;;  %s1363_s27 = smov 0  }
   0x5 LB: > { %s1378_s28 = sadd.s32 4294967295, %s1307_s27   ;;  %s865_s29 = sadd.s32 4294967294, %s1307_s27   ;;  %s1307_s27 = sphi %s1363_s27, %s1699_s27   ;;  %s1303_s26 = sphi %s1361_s26, %s1698_s26   ;;  %s1299_s25 = sphi %s1359_s25, %s1697_s25   ;;  %s1295_s24 = sphi %s1357_s24, %s1696_s24  }
   0x6   : > { %s1382_s30 = sadd.s32 1, %s1307_s27   ;;  %s172_s8 = sadd.s32 1, %s1303_s26 }
   0x7   : > { %s169_s9 = ssub.s32 %s1307_s27, %s1382_s30  ;;  %p182_p0 = scmp.ne.s32.totalorder %s1303_s26, %s1299_s25 }
   0x8   : > { %p170_p1 = scmp.eq.s32.totalorder %s169_s9, 0  ;;  %p183_p2 = scmp.eq.s32.totalorder %s1378_s28, 1 }
   0x9   : > { %p188_p3 = scmp.ne.s32.totalorder %s1299_s25, %s1295_s24  ;;  %p189_p4 = scmp.eq.s32.totalorder %s865_s29, 1 }
   0xa   : > { %s1393_s10 = scalar_select %p170_p1, %s1303_s26, %s172_s8  }
   0xb   : > { %p1395_p5 = por %p183_p2, %p182_p0  ;;  %p1399_p6 = por %p189_p4, %p188_p3 }
   0xc   : > { %p868_p7 = scmp.ge.s32.totalorder %s1307_s27, 1  ;;  %p267_p8 = scmp.lt.s32.totalorder %s1307_s27, 3 }
   0xe   : > { %p268_p9 = pnand %p868_p7, %p267_p8 }
   0xf   : > { %v442_v0 = vld [vmem:[%s1690_s5] sm:$0xff] (!%p268_p9)  ;;  %v443_v1 = vld [vmem:[%s1690_s5 + $0x8] sm:$0xff] (!%p268_p9)  ;;  %v444_v2 = vld [vmem:[%s1690_s5 + $0x10] sm:$0xff] (!%p268_p9)  ;;  %s871_s19 = sshll.u32 (!%p268_p9), %s1378_s28, 1  ;;  %p325_p10 = scmp.lt.s32.totalorder (!%p268_p9), %s1378_s28, 1  ;;  %v609_v5 = vlaneseq (!%p268_p9)  ;;  %vm631_vm1 = vcmask (!%p268_p9), 15360  }
  0x10   : > { %271 = sbr.rel (%p268_p9) target bundleno = 544 (0x220), region = 44  ;;  %v1077_v3 = vpack.c.bf16 (!%p268_p9), %v443_v1, %v442_v0  ;;  %v445_v4 = vld [vmem:[%s1690_s5 + $0x18] sm:$0xff] (!%p268_p9)  ;;  %p314_p11 = scmp.lt.s32.totalorder (!%p268_p9), %s871_s19, 3  ;;  %v446_v7 = vld [vmem:[%s1690_s5 + $0x20] sm:$0xff] (!%p268_p9)  ;;  %v447_v8 = vld [vmem:[%s1690_s5 + $0x28] sm:$0xff] (!%p268_p9) }
  0x11   : > { %v1081_v6 = vpack.c.bf16 (!%p268_p9), %v445_v4, %v444_v2  ;;  %v1085_v9 = vpack.c.bf16 (!%p268_p9), %v447_v8, %v446_v7  ;;  %v610_v10 = vshrl.u32 (!%p268_p9), %v609_v5, 7  ;;  %v448_v11 = vld [vmem:[%s1690_s5 + $0x30] sm:$0xff] (!%p268_p9)  ;;  %v449_v12 = vld [vmem:[%s1690_s5 + $0x38] sm:$0xff] (!%p268_p9)  ;;  %v450_v16 = vld [vmem:[%s1690_s5 + $0x40] sm:$0xff] (!%p268_p9)  ;;  %s884_s16 = sshll.u32 (!%p268_p9), %s1378_s28, 8 }
  0x12   : > { %1078 = vmatprep.subr.bf16.mxu1 (!%p268_p9), %v1077_v3  ;;  %v1089_v14 = vpack.c.bf16 (!%p268_p9), %v449_v12, %v448_v11  ;;  %v451_v17 = vld [vmem:[%s1690_s5 + $0x48] sm:$0xff] (!%p268_p9)  ;;  %v335_v20 = vld [vmem:[%s1688_s3] sm:$0xff] (!%p268_p9)  ;;  %v452_v23 = vld [vmem:[%s1690_s5 + $0x50] sm:$0xff] (!%p268_p9)  ;;  %s1599_s23 = scalar_lea.hbm (!%p268_p9), %s1691_s6, %s884_s16 }
  0x13   : > { %1080 = vmatpush3.bf16.msra.mxu1 (!%p268_p9), %v1077_v3  ;;  %v611_v15 = vsub.s32 (!%p268_p9), 0, %v610_v10  ;;  %v618_v18 = vsub.s32 (!%p268_p9), 1, %v610_v10  ;;  %v336_v21 = vld [vmem:[%s1688_s3 + $0x8] sm:$0xff] (!%p268_p9)  ;;  %v1093_v22 = vpack.c.bf16 (!%p268_p9), %v451_v17, %v450_v16  ;;  %v337_v26 = vld [vmem:[%s1688_s3 + $0x10] sm:$0xff] (!%p268_p9)  ;;  %v338_v27 = vld [vmem:[%s1688_s3 + $0x18] sm:$0xff] (!%p268_p9) }
  0x14   : > { %1082 = vmatprep.subr.bf16.mxu1 (!%p268_p9), %v1081_v6  ;;  %v1045_v25 = vpack.c.bf16 (!%p268_p9), %v336_v21, %v335_v20  ;;  %v453_v28 = vld [vmem:[%s1690_s5 + $0x58] sm:$0xff] (!%p268_p9)  ;;  %v1049_v29 = vpack.c.bf16 (!%p268_p9), %v338_v27, %v337_v26  ;;  %v339_v30 = vld [vmem:[%s1688_s3 + $0x20] sm:$0xff] (!%p268_p9)  ;;  %v340_v31 = vld [vmem:[%s1688_s3 + $0x28] sm:$0xff] (!%p268_p9)  ;;  %v1310_v20 = vmov (!%p268_p9), 0  }
  0x15   : > { %v1097_v33 = vpack.c.bf16 (!%p268_p9), %v453_v28, %v452_v23  ;;  %v454_v34 = vld [vmem:[%s1690_s5 + $0x60] sm:$0xff] (!%p268_p9)  ;;  %v1053_v35 = vpack.c.bf16 (!%p268_p9), %v340_v31, %v339_v30  ;;  %v455_v36 = vld [vmem:[%s1690_s5 + $0x68] sm:$0xff] (!%p268_p9)  ;;  %v341_v37 = vld [vmem:[%s1688_s3 + $0x30] sm:$0xff] (!%p268_p9)  ;;  %1194 = vset.pattern.permute.xlu0 (!%p268_p9), %v1310_v20 }
  0x16   : > { %1046 = vmatprep.subr.bf16.mxu0 (!%p268_p9), %v1045_v25  ;;  %v342_v38 = vld [vmem:[%s1688_s3 + $0x38] sm:$0xff] (!%p268_p9)  ;;  %v1101_v39 = vpack.c.bf16 (!%p268_p9), %v455_v36, %v454_v34  ;;  %v456_v40 = vld [vmem:[%s1690_s5 + $0x70] sm:$0xff] (!%p268_p9)  ;;  %v343_v43 = vld [vmem:[%s1688_s3 + $0x40] sm:$0xff] (!%p268_p9) }
  0x17   : > { %s326_s9 = scalar_select %p325_p10, %s1378_s28, 1  ;;  %1084 = vmatpush3.bf16.msra.mxu1 %v1081_v6  ;;  %1048 = vmatpush3.bf16.msra.mxu0 %v1045_v25  ;;  %v1057_v41 = vpack.c.bf16 %v342_v38, %v341_v37  ;;  %v457_v42 = vld [vmem:[%s1690_s5 + $0x78] sm:$0xff]  ;;  %v344_v44 = vld [vmem:[%s1688_s3 + $0x48] sm:$0xff]  ;;  %v426_v46 = vld [vmem:[%s1689_s4] sm:$0xff] }
  0x18   : > { %s1701_s19 = smov (!%p314_p11, %s871_s19), 3  ;;  %1086 = vmatprep.subr.bf16.mxu1 %v1085_v9  ;;  %1050 = vmatprep.subr.bf16.mxu0 %v1049_v29  ;;  %v1105_v45 = vpack.c.bf16 %v457_v42, %v456_v40  ;;  %v1061_v47 = vpack.c.bf16 %v344_v44, %v343_v43  ;;  %v427_v48 = vld [vmem:[%s1689_s4 + $0x8] sm:$0xff]  ;;  %v345_v49 = vld [vmem:[%s1688_s3 + $0x50] sm:$0xff]  ;;  %v346_v50 = vld [vmem:[%s1688_s3 + $0x58] sm:$0xff] }
  0x19   : > { %s872_s13 = sshll.u32 %s1701_s19, 3  ;;  %s875_s22 = sshll.u32 %s326_s9, 1  ;;  %v1109_v51 = vpack.c.bf16 %v427_v48, %v426_v46  ;;  %v1065_v52 = vpack.c.bf16 %v346_v50, %v345_v49  ;;  %v428_v53 = vld [vmem:[%s1689_s4 + $0x10] sm:$0xff]  ;;  %v429_v54 = vld [vmem:[%s1689_s4 + $0x18] sm:$0xff]  ;;  %v347_v55 = vld [vmem:[%s1688_s3 + $0x60] sm:$0xff] }
  0x1a   : > { %s1440_s21 = scalar_lea.vmem %s1686_s1, %s872_s13  ;;  %s328_s8 = scalar_lea.vmem %s1687_s2, %s875_s22  ;;  %v348_v56 = vld [vmem:[%s1688_s3 + $0x68] sm:$0xff]  ;;  %v1113_v58 = vpack.c.bf16 %v429_v54, %v428_v53  ;;  %v430_v60 = vld [vmem:[%s1689_s4 + $0x20] sm:$0xff]  ;;  %v349_v63 = vld [vmem:[%s1688_s3 + $0x70] sm:$0xff] }
  0x1b   : > { %v333_v13 = vld [vmem:[%s1440_s21] sm:$0xff]  ;;  %1088 = vmatpush3.bf16.msra.mxu1 %v1085_v9  ;;  %1052 = vmatpush3.bf16.msra.mxu0 %v1049_v29  ;;  %s1523_s20 = scalar_lea.vmem %s1685_s0, %s872_s13  ;;  %v334_v57 = vld [vmem:[%s1440_s21 + $0x8] sm:$0xff]  ;;  %v1069_v62 = vpack.c.bf16 %v348_v56, %v347_v55  ;;  %v350_v0 = vld [vmem:[%s1688_s3 + $0x78] sm:$0xff]  ;;  %s885_s22 = sshll.u32 %s1378_s28, 5 }
  0x1c   : > { %1007 = vmatprep.mubr.f32.mxu1 %v333_v13  ;;  %972 = vmatprep.mubr.f32.mxu0 %v333_v13  ;;  %v608_v19 = vld [vmem:[%s328_s8] sm:$0x3]  ;;  %v431_v61 = vld [vmem:[%s1689_s4 + $0x28] sm:$0xff]  ;;  %v432_v2 = vld [vmem:[%s1689_s4 + $0x30] sm:$0xff]  ;;  %v1073_v4 = vpack.c.bf16 %v350_v0, %v349_v63 }
  0x1d   : > { %1090 = vmatprep.subr.bf16.mxu1 %v1089_v14  ;;  %v612_v24 = vrot.slane %v608_v19, %v611_v15  ;;  %v619_v32 = vrot.slane %v608_v19, %v618_v18  ;;  %1054 = vmatprep.subr.bf16.mxu0 %v1053_v35  ;;  %v331_v59 = vld [vmem:[%s1523_s20] sm:$0xff]  ;;  %v1117_v1 = vpack.c.bf16 %v431_v61, %v430_v60  ;;  %v433_v3 = vld [vmem:[%s1689_s4 + $0x38] sm:$0xff]  ;;  %v435_v7 = vld [vmem:[%s1689_s4 + $0x48] sm:$0xff]  ;;  %v1309_v19 = vmov 1  }
  0x1e   : > { %v1121_v5 = vpack.c.bf16 %v433_v3, %v432_v2  ;;  %v434_v6 = vld [vmem:[%s1689_s4 + $0x40] sm:$0xff]  ;;  %v436_v9 = vld [vmem:[%s1689_s4 + $0x50] sm:$0xff]  ;;  %v437_v10 = vld [vmem:[%s1689_s4 + $0x58] sm:$0xff]  ;;  %1193 = vset.pattern.permute.xlu1 %v1309_v19 }
  0x1f   : > { %614 = vbcast.lane.b32.xlu0 %v612_v24, 256  ;;  %1092 = vmatpush3.bf16.msra.mxu1 %v1089_v14  ;;  %v1125_v8 = vpack.c.bf16 %v435_v7, %v434_v6  ;;  %v1129_v11 = vpack.c.bf16 %v437_v10, %v436_v9  ;;  %v438_v12 = vld [vmem:[%s1689_s4 + $0x60] sm:$0xff]  ;;  %v439_v13 = vld [vmem:[%s1689_s4 + $0x68] sm:$0xff]  ;;  %v440_v15 = vld [vmem:[%s1689_s4 + $0x70] sm:$0xff] }
  0x20   : > { %1094 = vmatprep.subr.bf16.mxu1 %v1093_v22  ;;  %1056 = vmatpush3.bf16.msra.mxu0 %v1053_v35  ;;  %v1133_v14 = vpack.c.bf16 %v439_v13, %v438_v12  ;;  %v441_v16 = vld [vmem:[%s1689_s4 + $0x78] sm:$0xff]  ;;  %v332_v18 = vld [vmem:[%s1523_s20 + $0x8] sm:$0xff]  ;;  %s1590_s20 = sand.u32 1, %s1299_s25  }
  0x21   : > { %1058 = vmatprep.subr.bf16.mxu0 %v1057_v41  ;;  %v1137_v17 = vpack.c.bf16 %v441_v16, %v440_v15  ;;  %s869_s13 = sshll.u32 %s1590_s20, 4  ;;  %s870_s21 = sshll.u32 %s1590_s20, 1 }
  0x22   : > { %s305_s8 = scalar_lea.vmem [#allocation2], %s869_s13  ;;  %s1604_s29 = scalar_lea.vmem [#allocation4], %s870_s21 }
  0x23   : > { %621 = vbcast.lane.b32.xlu0 %v619_v32, 256  ;;  %1096 = vmatpush3.bf16.msra.mxu1 %v1093_v22  ;;  %s731_s17 = sshll.u32 %s305_s8, 4  ;;  %s713_s19 = scalar_lea.sflag [#allocation3], %s1590_s20  ;;  %s1601_s17 = int_to_ptr.vmem [resolvable:$true] %s731_s17 }
  0x24   : > { %1098 = vmatprep.subr.bf16.mxu1 %v1097_v33  ;;  %1060 = vmatpush3.bf16.msra.mxu0 %v1057_v41  ;;  %s1213_s15 = scalar_lea.vmem %s1601_s17, 256  ;;  %s1311_s13 = smov [#allocation2]  }
  0x25   : > { %1062 = vmatprep.subr.bf16.mxu0 %v1061_v47  ;;  %p1214_p12 = scmp.ne.s32.totalorder %s1601_s17, %s1213_s15  ;;  %s1217_s16 = sshll.u32 %s1311_s13, 4  ;;  %s1218_s16 = int_to_ptr.vmem [resolvable:$false] %s1217_s16 }
  0x26   : > { %s1219_s9 = scalar_lea.vmem %s1218_s16, 512  ;;  %p1220_p1 = scmp.lt.s32.totalorder %s1601_s17, %s1218_s16 }
  0x27   : > { %1100 = vmatpush3.bf16.msra.mxu1 %v1097_v33  ;;  %p1215_p13 = pnand %p1214_p12, %p1395_p5  ;;  %p1221_p2 = scmp.lt.s32.totalorder %s1219_s9, %s1213_s15 }
  0x28   : > { %1102 = vmatprep.subr.bf16.mxu1 %v1101_v39  ;;  %1064 = vmatpush3.bf16.msra.mxu0 %v1061_v47 }
  0x29   : > { %1066 = vmatprep.subr.bf16.mxu0 %v1065_v52  ;;  %p1216_p0 = pneg %p1215_p13  ;;  %p1222_p3 = por %p1221_p2, %p1220_p1 }
  0x2b   : > { %1104 = vmatpush3.bf16.msra.mxu1 %v1101_v39  ;;  %p1223_p4 = pnand %p1222_p3, %p1216_p0 }
  0x2c   : > { %1106 = vmatprep.subr.bf16.mxu1 %v1105_v45  ;;  %1068 = vmatpush3.bf16.msra.mxu0 %v1065_v52 }
  0x2d   : > { %1070 = vmatprep.subr.bf16.mxu0 %v1069_v62 }
  0x2f   : > { %1108 = vmatpush3.bf16.msra.mxu1 %v1105_v45 }
  0x30   : > { %1110 = vmatprep.subr.bf16.mxu1 %v1109_v51  ;;  %1072 = vmatpush3.bf16.msra.mxu0 %v1069_v62 }
  0x31   : > { %1074 = vmatprep.subr.bf16.mxu0 %v1073_v4 }
  0x32   : > { %1008 = vmatmul.mubr.f32.vlgmr.msra.gmra.mrb[0].mxu1 %v334_v57 }
  0x33   : > { %1112 = vmatpush3.bf16.msra.mxu1 %v1109_v51  ;;  %1042 = vmatprep.mubr.f32.mxu1 %v331_v59 }
  0x34   : > { %1114 = vmatprep.subr.bf16.mxu1 %v1113_v58  ;;  %1076 = vmatpush3.bf16.msra.mxu0 %v1073_v4 }
  0x37   : > { %1116 = vmatpush3.bf16.msra.mxu1 %v1113_v58  ;;  %973 = vmatmul.mubr.f32.vlgmr.msra.gmra.mrb[0].mxu0 %v334_v57 }
  0x38   : > { %1118 = vmatprep.subr.bf16.mxu1 %v1117_v1 }
  0x3b   : > { %1120 = vmatpush3.bf16.msra.mxu1 %v1117_v1 }
  0x3c   : > { %1122 = vmatprep.subr.bf16.mxu1 %v1121_v5 }
  0x3f   : > { %1124 = vmatpush3.bf16.msra.mxu1 %v1121_v5 }
  0x40   : > { %1126 = vmatprep.subr.bf16.mxu1 %v1125_v8 }
  0x43   : > { %1128 = vmatpush3.bf16.msra.mxu1 %v1125_v8 }
  0x44   : > { %1130 = vmatprep.subr.bf16.mxu1 %v1129_v11 }
  0x47   : > { %1132 = vmatpush3.bf16.msra.mxu1 %v1129_v11 }
  0x48   : > { %1134 = vmatprep.subr.bf16.mxu1 %v1133_v14 }
  0x4b   : > { %1136 = vmatpush3.bf16.msra.mxu1 %v1133_v14 }
  0x4c   : > { %1138 = vmatprep.subr.bf16.mxu1 %v1137_v17 }
  0x4f   : > { %1140 = vmatpush3.bf16.msra.mxu1 %v1137_v17 }
  0x52   : > { %1043 = vmatmul.mubr.f32.vlgmr.msra.gmra.mrb[0].mxu1 %v332_v18 }
  0x91   : > { %v615_v23 = vpop.permute.xlu0 %614 }
  0x95   : > { %v622_v24 = vpop.permute.xlu0 %621 }
 0x10a   : > { %v1577_v21 = vpop.f32.mrb[0].mxu0 }
 0x10b   : > { %v1579_v22 = vpop.f32.mrb[1].mxu0 }
 0x125   : > { %v1044_v25 = vpop.f32.mrb[0].mxu1 }
 0x126   : > { %v624_v26 = vadd.f32 %v1044_v25, %v622_v24  ;;  %v599_v27 = vpop.f32.mrb[1].mxu1 }
 0x127   : > { %v623_v28 = vadd.f32 %v615_v23, %v599_v27 }
 0x128   : > { %vm626_vm0 = vcmp.ge.f32.partialorder %v624_v26, 0.0  ;;  %v628_v29 = vmul.f32 0.01, %v624_v26 }
 0x129   : > { %vm625_vm2 = vcmp.ge.f32.partialorder %v623_v28, 0.0  ;;  %v627_v30 = vmul.f32 0.01, %v623_v28 }
 0x12a   : > { %v630_v31 = vsel %vm626_vm0, %v624_v26, %v628_v29 }
 0x12b   : > { %v639_v32 = vsel %vm631_vm1, %v630_v31, -inf  ;;  %v629_v33 = vsel %vm625_vm2, %v623_v28, %v627_v30 }
 0x12c   : > { %v640_v34 = vrot.slane %v639_v32, 4  ;;  %v632_v35 = vsel %vm631_vm1, %v629_v33, -inf }
 0x12d   : > { %v633_v36 = vrot.slane %v632_v35, 4 }
 0x12e   : > { %v641_v37 = vmax.f32 %v639_v32, %v640_v34 }
 0x12f   : > { %v634_v38 = vmax.f32 %v632_v35, %v633_v36 }
 0x130   : > { %v642_v39 = vrot.slane %v641_v37, 2 }
 0x131   : > { %v635_v40 = vrot.slane %v634_v38, 2 }
 0x132   : > { %v643_v41 = vmax.f32 %v641_v37, %v642_v39 }
 0x133   : > { %v636_v42 = vmax.f32 %v634_v38, %v635_v40 }
 0x134   : > { %v644_v43 = vrot.slane %v643_v41, 1 }
 0x135   : > { %v637_v44 = vrot.slane %v636_v42, 1 }
 0x136   : > { %v645_v45 = vmax.f32 %v643_v41, %v644_v43 }
 0x137   : > { %v638_v46 = vmax.f32 %v636_v42, %v637_v44 }
 0x138   : > { %v647_v47 = vsub.f32 %v630_v31, %v645_v45 }
 0x139   : > { %v646_v48 = vsub.f32 %v629_v33, %v638_v46 }
 0x13a   : > { %v650_v49 = vmul.f32 1.442695, %v647_v47 }
 0x13b   : > { %v648_v50 = vmul.f32 1.442695, %v646_v48 }
 0x13c   : > { %1197 = vpow2.f32 %v650_v49 }
 0x13d   : > { %1199 = vpow2.f32 %v648_v50 }
 0x146   : > { %v1198_v51 = vpop.eup %1197 }
 0x147   : > { %v1200_v52 = vpop.eup %1199  ;;  %v659_v53 = vsel %vm631_vm1, %v1198_v51, 0.0 }
 0x148   : > { %v660_v54 = vrot.slane %v659_v53, 4  ;;  %v652_v55 = vsel %vm631_vm1, %v1200_v52, 0.0 }
 0x149   : > { %v653_v56 = vrot.slane %v652_v55, 4 }
 0x14a   : > { %v661_v57 = vadd.f32 %v660_v54, %v659_v53 }
 0x14b   : > { %v654_v58 = vadd.f32 %v653_v56, %v652_v55 }
 0x14c   : > { %v662_v59 = vrot.slane %v661_v57, 2 }
 0x14d   : > { %v655_v60 = vrot.slane %v654_v58, 2 }
 0x14e   : > { %v663_v61 = vadd.f32 %v662_v59, %v661_v57 }
 0x14f   : > { %v656_v62 = vadd.f32 %v655_v60, %v654_v58 }
 0x150   : > { %v664_v63 = vrot.slane %v663_v61, 1 }
 0x151   : > { %v657_v0 = vrot.slane %v656_v62, 1 }
 0x152   : > { %v665_v2 = vadd.f32 %v664_v63, %v663_v61 }
 0x153   : > { %v658_v1 = vadd.f32 %v657_v0, %v656_v62 }
 0x155   : > { %1201 = vrcp.f32 %v658_v1 }
 0x156   : > { %1203 = vrcp.f32 %v665_v2 }
 0x15f   : > { %v1202_v3 = vpop.eup %1201 }
 0x160   : > { %v667_v4 = vmul.f32 %v1202_v3, %v1200_v52  ;;  %v1204_v5 = vpop.eup %1203 }
 0x161   : > { %v669_v6 = vmul.f32 %v1204_v5, %v1198_v51 }
 0x162   : > { %672 = vperm.xlu0 %1194, %v667_v4   ;;  %687 = vperm.xlu1 %1193, %v667_v4  }
 0x166   : > { %691 = vperm.xlu1 %1193, %v669_v6   ;;  %1196 = vset.pattern.permute.xlu0 %v1309_v19 }
 0x16a   : > { %1195 = vset.pattern.permute.xlu1 %v1310_v20 }
 0x16b   : > { %677 = vperm.xlu1 %1195, %v669_v6  }
 0x1e1   : > { %v673_v7 = vpop.permute.xlu0 %672  ;;  %v688_v8 = vpop.permute.xlu1 %687 }
 0x1e2   : > { %v680_v9 = vmul.f32 %v673_v7, %v1579_v22  ;;  %v694_v10 = vmul.f32 %v688_v8, %v1579_v22 }
 0x1e4   : > { %1205 = vtanh.f32 %v680_v9  ;;  %v696_v11 = vrot.slane %v694_v10, 4 }
 0x1e5   : > { %v692_v12 = vpop.permute.xlu1 %691 }
 0x1e6   : > { %v697_v13 = vadd.f32 %v696_v11, %v694_v10  ;;  %v695_v14 = vmul.f32 %v1577_v21, %v692_v12 }
 0x1e8   : > { %v698_v15 = vrot.slane %v697_v13, 2  ;;  %v702_v16 = vrot.slane %v695_v14, 4 }
 0x1ea   : > { %v699_v17 = vadd.f32 %v698_v15, %v697_v13  ;;  %v703_v18 = vadd.f32 %v702_v16, %v695_v14  ;;  %v678_v19 = vpop.permute.xlu1 %677 }
 0x1eb   : > { %v681_v20 = vmul.f32 %v1577_v21, %v678_v19 }
 0x1ec   : > { %v700_v22 = vrot.slane %v699_v17, 1  ;;  %v704_v23 = vrot.slane %v703_v18, 2 }
 0x1ed   : > { %1207 = vtanh.f32 %v681_v20 }
 0x1ee   : > { %v1206_v24 = vpop.eup %1205  ;;  %v701_v25 = vadd.f32 %v700_v22, %v699_v17  ;;  %v705_v26 = vadd.f32 %v704_v23, %v703_v18 }
 0x1ef   : > { %684 = vst [vmem:[%s305_s8] sm:$0xff] %v1206_v24 }
 0x1f0   : > { %1209 = vtanh.f32 %v701_v25  ;;  %v706_v27 = vrot.slane %v705_v26, 1 }
 0x1f2   : > { %v707_v28 = vadd.f32 %v706_v27, %v705_v26 }
 0x1f4   : > { %1211 = vtanh.f32 %v707_v28 }
 0x1f7   : > { %v1208_v21 = vpop.eup %1207 }
 0x1f8   : > { %685 = vst [vmem:[%s305_s8 + $0x8] sm:$0xff] %v1208_v21 }
 0x1f9   : > { %1226 = shalt.err (!%p1223_p4)
}
 0x1fa   : > { %s1227_s8 = scalar_lea.hbm %s1599_s23, 256  ;;  %s1231_s13 = scalar_lea.hbm %s1691_s6, 512 }
 0x1fb   : > { %p1228_p7 = scmp.ne.s32.totalorder %s1599_s23, %s1227_s8  ;;  %p1232_p10 = scmp.lt.u32.totalorder %s1599_s23, %s1691_s6 }
 0x1fc   : > { %p1233_p11 = scmp.lt.u32.totalorder %s1231_s13, %s1227_s8  ;;  %p1235_p13 = scmp.lt.u32.totalorder %s1227_s8, %s1599_s23 }
 0x1fd   : > { %p1229_p8 = pnand %p1228_p7, %p1395_p5 }
 0x1fe   : > { %p1234_p12 = por %p1233_p11, %p1232_p10 }
 0x1ff   : > { %p1230_p9 = pneg %p1229_p8 }
 0x200   : > { %p1236_p0 = por %p1235_p13, %p1234_p12 }
 0x202   : > { %p1237_p1 = pnand %p1236_p0, %p1230_p9 }
 0x204   : > { %1240 = shalt.err (!%p1237_p1)
}
 0x205   : > { %s1312_s15 = smov 128   ;;  %s1313_s9 = smov 8   ;;  %v1210_v29 = vpop.eup %1209 }
 0x206   : > { %1143 = dma.vmem_to_hbm [thread:$0]  (%p1395_p5), %s1601_s17, 256, %s1599_s23, %s713_s19, %s1312_s15, %s1312_s15, %s1313_s9   ;;  %v1212_v30 = vpop.eup %1211 }
 0x207   : > { %710 = vst [vmem:[%s1604_s29] sm:$0x1] %v1210_v29  ;;  %s1637_s21 = scalar_lea.hbm %s1692_s7, %s885_s22  ;;  %s1695_s18 = sshll.u32 %s1604_s29, 4  ;;  %711 = vst [vmem:[%s1604_s29 + $0x1] sm:$0x1] %v1212_v30  ;;  %s1641_s18 = int_to_ptr.vmem [resolvable:$true] %s1695_s18 }
 0x208   : > { %s718_s13 = scalar_lea.sflag [#allocation5], %s1590_s20  ;;  %s1241_s16 = scalar_lea.vmem %s1641_s18, 32 }
 0x209   : > { %p1242_p2 = scmp.ne.s32.totalorder %s1641_s18, %s1241_s16  ;;  %s1314_s28 = smov [#allocation4]  }
 0x20a   : > { %s1245_s17 = sshll.u32 %s1314_s28, 4  ;;  %s1246_s17 = int_to_ptr.vmem [resolvable:$false] %s1245_s17 }
 0x20b   : > { %p1243_p3 = pnand %p1242_p2, %p1395_p5  ;;  %s1247_s23 = scalar_lea.vmem %s1246_s17, 64 }
 0x20c   : > { %p1248_p7 = scmp.lt.s32.totalorder %s1641_s18, %s1246_s17  ;;  %p1249_p8 = scmp.lt.s32.totalorder %s1247_s23, %s1241_s16 }
 0x20d   : > { %p1244_p4 = pneg %p1243_p3 }
 0x20e   : > { %p1250_p9 = por %p1249_p8, %p1248_p7 }
 0x210   : > { %p1251_p10 = pnand %p1250_p9, %p1244_p4 }
 0x212   : > { %1254 = shalt.err (!%p1251_p10)
}
 0x213   : > { %s1255_s22 = scalar_lea.hbm %s1637_s21, 32  ;;  %s1259_s15 = scalar_lea.hbm %s1692_s7, 64 }
 0x214   : > { %p1256_p11 = scmp.ne.s32.totalorder %s1637_s21, %s1255_s22  ;;  %p1260_p0 = scmp.lt.u32.totalorder %s1637_s21, %s1692_s7 }
 0x215   : > { %p1261_p1 = scmp.lt.u32.totalorder %s1259_s15, %s1255_s22  ;;  %p1263_p3 = scmp.lt.u32.totalorder %s1255_s22, %s1637_s21 }
 0x216   : > { %p1257_p12 = pnand %p1256_p11, %p1395_p5 }
 0x217   : > { %p1262_p2 = por %p1261_p1, %p1260_p0 }
 0x218   : > { %p1258_p13 = pneg %p1257_p12 }
 0x219   : > { %p1264_p4 = por %p1263_p3, %p1262_p2 }
 0x21b   : > { %p1265_p7 = pnand %p1264_p4, %p1258_p13 }
 0x21d   : > { %1268 = shalt.err (!%p1265_p7)
}
 0x21e   : > { %s1315_s8 = smov 16   ;;  %s1316_s16 = smov 1  }
 0x21f   : > { %1144 = dma.vmem_to_hbm [thread:$0]  (%p1395_p5), %s1641_s18, 32, %s1637_s21, %s718_s13, %s1315_s8, %s1315_s8, %s1316_s16  }
 0x220 PF: > { %p1154_p8 = scmp.ge.s32.totalorder %s1307_s27, 2  ;;  %s762_s28 = sand.u32 1, %s1295_s24  }
 0x221   : > { %s763_s17 = scalar_lea.sflag [#allocation3], %s762_s28 }
 0x222   : > { %p1148_p9 = pnand %p1154_p8, %p1399_p6 }
 0x224   : > { %1286 = dma.done.wait (!%p1148_p9), %s763_s17, 256  }
 0x225   : > { %1288 = vsyncadd (!%p1148_p9), %s763_s17, 4294967040  ;;  %s772_s23 = scalar_lea.sflag [#allocation5], %s762_s28 }
 0x226   : > { %1290 = dma.done.wait (!%p1148_p9), %s772_s23, 32  }
 0x227   : > { %1292 = vsyncadd (!%p1148_p9), %s772_s23, 4294967264  ;;  %p21_p5 = scmp.ge.s32.totalorder %s1382_s30, 4   ;;  %s1696_s24 = smov %s1299_s25 }
 0x228   : > { %s1697_s25 = smov %s1303_s26  ;;  %s1698_s26 = smov %s1393_s10 }
 0x229   : > { %s1699_s27 = smov %s1382_s30  ;;  %23 = sbr.rel (!%p21_p5) target bundleno = 5 (0x5), region = 102 }
 0x230   :  { %777 = vsyncpa [#allocation3], 1 }
 0x231   :  { %779 = vsyncpa [#allocation3 + $0x1], 1 }
 0x232   :  { %780 = vsyncpa [#allocation5], 1 }
 0x233   :  { %782 = vsyncpa [#allocation5 + $0x1], 1 }

</bundles_post_ra>
